<compile_context>
chip_gen: v7x
topology: tpu7x:2x2x1
jax: 0.10.0
libtpu: 0.0.40
codegen_flags: <defaults>
</compile_context>

<pallas_src>
import functools

import numpy as np
import jax
import jax.numpy as jnp
from jax.experimental import pallas as pl
from jax.experimental.pallas import tpu as pltpu


def _round_up(x, m):
    return (x + m - 1) // m * m


# ---------------------------------------------------------------------------
# 1-D bilinear interpolation matrices (PyTorch align_corners=False), cached.
# ---------------------------------------------------------------------------
@functools.lru_cache(maxsize=None)
def _interp_matrix(out_size: int, in_size: int) -> np.ndarray:
    i = np.arange(out_size, dtype=np.float64)
    scale = in_size / out_size
    src = np.maximum((i + 0.5) * scale - 0.5, 0.0)      # PyTorch clamps negative src
    i0 = np.clip(np.floor(src).astype(np.int64), 0, in_size - 1)
    i1 = np.minimum(i0 + 1, in_size - 1)
    lam = src - i0
    M = np.zeros((out_size, in_size), np.float64)
    M[np.arange(out_size), i0] += 1.0 - lam
    M[np.arange(out_size), i1] += lam
    return M.astype(np.float32)


# ---------------------------------------------------------------------------
# In-kernel helpers (lane-flattened, halo-padded, 128-aligned core layout).
# ---------------------------------------------------------------------------
def _conv3x3(tap, w_ref, b_ref, *, base, row_len):
    """3x3 conv = 9 accumulating MXU matmuls over contiguous lane-slices.

    tap(off) -> (Cin, l_core) operand for tap offset off; the taps are already
    pre-activated (ReLU fused at store), so no per-tap VPU work here.
    w_ref: (9, Cout, Cin), b_ref: (Cout, 1).  f32 accumulation; pairwise tree
    reduction halves the VPU add-chain depth.
    """
    parts = []
    for dy in range(3):
        for dx in range(3):
            x = tap(base + dy * row_len + dx)          # contiguous slice, no relayout
            w = w_ref[dy * 3 + dx]                     # (Cout, Cin)
            parts.append(jnp.dot(w, x, preferred_element_type=jnp.float32))
    while len(parts) > 1:                              # tree-reduce (depth 4, not 8)
        nxt = [parts[i] + parts[i + 1] for i in range(0, len(parts) - 1, 2)]
        if len(parts) % 2:
            nxt.append(parts[-1])
        parts = nxt
    return parts[0] + b_ref[...].astype(jnp.float32)   # (Cout,1) broadcasts over lanes


def _refine_kernel(f_ref, u_ref, mask_ref,
                   w0_ref, b0_ref,                     # convFS
                   w1_ref, b1_ref, w2_ref, b2_ref,     # ResFS
                   w3_ref, b3_ref, w4_ref, b4_ref,     # ResMM
                   o_ref, p_ref, q_ref,
                   *, H, W, core_off):
    row_len = W + 2
    l_core = H * row_len
    base = core_off - (row_len + 1)        # start of the padded image inside buffers
    n_act = p_ref.shape[0]                 # planes
    l_alloc = p_ref.shape[-1]
    l_out = o_ref.shape[-1]
    tail = l_alloc - core_off - l_core

    # Zero ONLY the halo head/tail lanes.  The core region is fully overwritten by
    # every masked store below, and the intra-row halo columns are zeroed by the
    # column mask -- so the full-buffer memset of v1 is gone.
    zeros_head = jnp.zeros((n_act, core_off), p_ref.dtype)
    zeros_tail = jnp.zeros((n_act, tail), p_ref.dtype)
    p_ref[:, pl.ds(0, core_off)] = zeros_head
    q_ref[:, pl.ds(0, core_off)] = zeros_head
    p_ref[:, pl.ds(core_off + l_core, tail)] = zeros_tail
    q_ref[:, pl.ds(core_off + l_core, tail)] = zeros_tail

    mask = mask_ref[...]                   # (1, l_core): 1.0 real cols, 0.0 halo cols

    conv = functools.partial(_conv3x3, base=base, row_len=row_len)
    f_tap = lambda off: f_ref[0, :, pl.ds(off, l_core)]
    p_tap = lambda off: p_ref[:, pl.ds(off, l_core)]
    q_tap = lambda off: q_ref[:, pl.ds(off, l_core)]

    def store(dst_ref, act):
        # ReLU fused into the single lane-aligned store (core_off % 128 == 0);
        # `mask` zeroes the 2 halo columns of every row so they read back as the
        # zero padding of the next conv.
        dst_ref[:, pl.ds(core_off, l_core)] = (
            jnp.maximum(act, 0.0) * mask).astype(dst_ref.dtype)

    # ---- convFS: x = conv(f); raw x kept live for the ResFS residual add ----
    x = conv(f_tap, w0_ref, b0_ref)
    store(q_ref, x)                                      # Q <- pad(relu(x))

    # ---- ResFS: s = x + conv2(relu(conv1(relu(x)))) --------------------------
    r = conv(q_tap, w1_ref, b1_ref)
    store(p_ref, r)                                      # P <- pad(relu(r1))
    r = conv(p_tap, w2_ref, b2_ref)

    # ---- m = s + bilinear_upsample(pm)  (upsample precomputed separably) -----
    m = x + r + u_ref[0, :, pl.ds(0, l_core)].astype(jnp.float32)
    store(q_ref, m)                                      # Q <- pad(relu(m))

    # ---- ResMM: out = m + conv2(relu(conv1(relu(m)))) -------------------------
    r = conv(q_tap, w3_ref, b3_ref)
    store(p_ref, r)                                      # P <- pad(relu(r1'))
    r = conv(p_tap, w4_ref, b4_ref)
    out = m + r

    o_ref[0, :, pl.ds(0, l_core)] = out.astype(o_ref.dtype)
    if l_out > l_core:                                   # keep the pad lanes clean
        o_ref[0, :, pl.ds(l_core, l_out - l_core)] = jnp.zeros(
            (n_act, l_out - l_core), o_ref.dtype)


# ---------------------------------------------------------------------------
# Wrapper: one fused pallas_call for the whole Refine forward (NCHW in/out).
# ---------------------------------------------------------------------------
def refine_forward(f_nchw, pm_nchw, params, *, compute_dtype=jnp.float32):
    """Refine.forward: f (N, inplanes, H, W), pm (N, planes, Hp, Wp) -> (N, planes, H, W).

    compute_dtype=jnp.bfloat16 pre-casts f + weights and keeps the activation
    scratch in bf16 (f32 accumulation) -- recommended on v6e/v7x.  Default f32
    matches the PyTorch reference up to MXU accumulation order.
    """
    N, c_in, H, W = f_nchw.shape
    planes = params['convFS_w'].shape[0]
    _, pm_c, Hp, Wp = pm_nchw.shape
    assert pm_c == planes

    row_len = W + 2
    l_core = H * row_len
    l_pad = (H + 2) * row_len
    core_off = _round_up(row_len + 1, 128)     # 128-lane aligned core region start
    base = core_off - (row_len + 1)
    # Tap slices read up to core_off + l_core + row_len + 1 lanes.
    l_alloc = _round_up(core_off + l_core + row_len + 1, 128)
    l_out = _round_up(l_core, 128)             # lane-dense, 128-aligned output / u

    act_dtype = compute_dtype

    # Input f: halo-pad once, flatten spatial onto lanes, place at `base` so the
    # core lands exactly at the aligned core_off used by the kernel taps.
    f_flat = jnp.pad(f_nchw, ((0, 0), (0, 0), (1, 1), (1, 1))).reshape(N, c_in, l_pad)
    f_buf = jnp.pad(f_flat, ((0, 0), (0, 0), (base, l_alloc - base - l_pad)))
    f_buf = f_buf.astype(act_dtype)

    # Separable bilinear upsample of the tiny low-res pm (align_corners=False):
    # Ah along H, AwJ along W with `row_len - W` appended zero rows so the result
    # lands directly in the kernel's core-flat layout (halo columns pre-zeroed).
    Ah = jnp.asarray(_interp_matrix(H, Hp))
    Aw = _interp_matrix(W, Wp)
    AwJ = jnp.asarray(np.concatenate([Aw, np.zeros((row_len - W, Wp), np.float32)], 0))
    u = jnp.einsum('ip,ncpq,jq->ncij', Ah, pm_nchw, AwJ,
                   precision=jax.lax.Precision.HIGHEST).reshape(N, planes, l_core)
    u = jnp.pad(u, ((0, 0), (0, 0), (0, l_out - l_core)))   # 128-aligned lane dim

    # Column mask: 1.0 on the W real columns of each row, 0.0 on the 2 halo cols.
    colmask = np.tile(np.concatenate([np.ones((W,), np.float32),
                                      np.zeros((row_len - W,), np.float32)]), H)
    colmask = jnp.asarray(colmask[None, :])                  # (1, l_core)

    # Conv weights: PyTorch OIHW -> (9, Cout, Cin) (pre-cast), bias -> (Cout, 1) f32.
    def w9(w):
        co, ci = w.shape[0], w.shape[1]
        return jnp.transpose(w, (2, 3, 0, 1)).reshape(9, co, ci).astype(act_dtype)

    def col(b):
        return b.reshape(-1, 1).astype(jnp.float32)

    weights = [
        (w9(params['convFS_w']), col(params['convFS_b'])),
        (w9(params['ResFS_w1']), col(params['ResFS_b1'])),
        (w9(params['ResFS_w2']), col(params['ResFS_b2'])),
        (w9(params['ResMM_w1']), col(params['ResMM_b1'])),
        (w9(params['ResMM_w2']), col(params['ResMM_b2'])),
    ]

    in_specs = [
        pl.BlockSpec((1, c_in, l_alloc), lambda n: (n, 0, 0)),    # halo-padded f
        pl.BlockSpec((1, planes, l_out), lambda n: (n, 0, 0)),    # upsampled pm
        pl.BlockSpec((1, l_core), lambda n: (0, 0)),              # halo-column mask
    ]
    args = [f_buf, u, colmask]
    for w, b in weights:
        in_specs.append(pl.BlockSpec(w.shape, lambda n: (0, 0, 0)))
        in_specs.append(pl.BlockSpec(b.shape, lambda n: (0, 0)))
        args.extend([w, b])

    # Explicit VMEM budget (v7x: 64 MiB physical / 32 MiB scoped default;
    # v5e: 16 MiB scoped default).  Double-buffered blocks + the two scratches.
    isz = int(np.dtype(act_dtype).itemsize)
    osz = int(np.dtype(f_nchw.dtype).itemsize)
    est = 2 * (c_in * l_alloc * isz + planes * l_out * 4
               + planes * l_out * osz + l_core * 4)
    est += 2 * sum(int(np.prod(w.shape)) * isz + int(np.prod(b.shape)) * 4
                   for w, b in weights)
    est += 2 * planes * l_alloc * isz
    vmem_limit = int(min(max(4 * est, 8 << 20), 48 << 20))

    kernel = functools.partial(_refine_kernel, H=H, W=W, core_off=core_off)

    out = pl.pallas_call(
        kernel,
        out_shape=jax.ShapeDtypeStruct((N, planes, l_out), f_nchw.dtype),
        grid=(N,),
        in_specs=in_specs,
        out_specs=pl.BlockSpec((1, planes, l_out), lambda n: (n, 0, 0)),
        scratch_shapes=[
            pltpu.VMEM((planes, l_alloc), act_dtype),   # ping (pre-activated act)
            pltpu.VMEM((planes, l_alloc), act_dtype),   # pong
        ],
        # Batch axis is parallel -> both v7x TensorCores get work when N >= 2.
        compiler_params=pltpu.CompilerParams(
            dimension_semantics=("parallel",),
            vmem_limit_bytes=vmem_limit),
    )(*args)

    # Strip the pad lanes + the 2 halo columns; output is already NCHW.
    return out[:, :, :l_core].reshape(N, planes, H, row_len)[:, :, :, :W]


# ---------------------------------------------------------------------------
# Pure-JAX (XLA) reference with identical semantics, used for validation.
# ---------------------------------------------------------------------------
def _refine_reference(f, pm, params):
    hp = jax.lax.Precision.HIGHEST

    def conv(x, w, b):
        y = jax.lax.conv_general_dilated(
            x, w, window_strides=(1, 1), padding=((1, 1), (1, 1)),
            dimension_numbers=('NCHW', 'OIHW', 'NCHW'), precision=hp)
        return y + b[None, :, None, None]

    def res_block(x, w1, b1, w2, b2):
        r = conv(jnp.maximum(x, 0.0), w1, b1)
        r = conv(jnp.maximum(r, 0.0), w2, b2)
        return x + r

    x = conv(f, params['convFS_w'], params['convFS_b'])
    s = res_block(x, params['ResFS_w1'], params['ResFS_b1'],
                  params['ResFS_w2'], params['ResFS_b2'])
    H, W = s.shape[2], s.shape[3]
    Hp, Wp = pm.shape[2], pm.shape[3]
    Ah = jnp.asarray(_interp_matrix(H, Hp))
    Aw = jnp.asarray(_interp_matrix(W, Wp))
    up = jnp.einsum('ip,ncpq,jq->ncij', Ah, pm, Aw, precision=hp)
    m = s + up
    return res_block(m, params['ResMM_w1'], params['ResMM_b1'],
                     params['ResMM_w2'], params['ResMM_b2'])


# ---------------------------------------------------------------------------
if __name__ == "__main__":
    key = jax.random.PRNGKey(0)
    N, inplanes, planes = 2, 4, 8
    H = W = 16
    Hp = Wp = 8

    keys = jax.random.split(key, 12)

    def conv_params(kw, kb, cin, cout):
        w = 0.1 * jax.random.normal(kw, (cout, cin, 3, 3), jnp.float32)   # OIHW
        b = 0.1 * jax.random.normal(kb, (cout,), jnp.float32)
        return w, b

    params = {}
    params['convFS_w'], params['convFS_b'] = conv_params(keys[0], keys[1], inplanes, planes)
    params['ResFS_w1'], params['ResFS_b1'] = conv_params(keys[2], keys[3], planes, planes)
    params['ResFS_w2'], params['ResFS_b2'] = conv_params(keys[4], keys[5], planes, planes)
    params['ResMM_w1'], params['ResMM_b1'] = conv_params(keys[6], keys[7], planes, planes)
    params['ResMM_w2'], params['ResMM_b2'] = conv_params(keys[8], keys[9], planes, planes)

    f = jax.random.normal(keys[10], (N, inplanes, H, W), jnp.float32)     # NCHW
    pm = jax.random.normal(keys[11], (N, planes, Hp, Wp), jnp.float32)    # NCHW

    out = jax.jit(refine_forward)(f, pm, params)
    jax.block_until_ready(out)
    assert out.shape == (N, planes, H, W)

    # Validate against the pure-JAX reference of the same module.
    ref = _refine_reference(f, pm, params)
    max_err = float(jnp.max(jnp.abs(out - ref)))
    assert max_err < 5e-2, f"mismatch vs reference: {max_err}"

    print("KERNEL_OK")
</pallas_src>

<mosaic_0001>
module attributes {stable_mosaic.version = 11 : i64} {
  func.func @_refine_kernel(%arg0: i32, %arg1: memref<1x4x512xf32, #tpu.memory_space<vmem>>, %arg2: memref<1x8x384xf32, #tpu.memory_space<vmem>>, %arg3: memref<1x288xf32, #tpu.memory_space<vmem>>, %arg4: memref<9x8x4xf32, #tpu.memory_space<vmem>>, %arg5: memref<8x1xf32, #tpu.memory_space<vmem>>, %arg6: memref<9x8x8xf32, #tpu.memory_space<vmem>>, %arg7: memref<8x1xf32, #tpu.memory_space<vmem>>, %arg8: memref<9x8x8xf32, #tpu.memory_space<vmem>>, %arg9: memref<8x1xf32, #tpu.memory_space<vmem>>, %arg10: memref<9x8x8xf32, #tpu.memory_space<vmem>>, %arg11: memref<8x1xf32, #tpu.memory_space<vmem>>, %arg12: memref<9x8x8xf32, #tpu.memory_space<vmem>>, %arg13: memref<8x1xf32, #tpu.memory_space<vmem>>, %arg14: memref<1x8x384xf32, #tpu.memory_space<vmem>>, %arg15: memref<8x512xf32, #tpu.memory_space<vmem>>, %arg16: memref<8x512xf32, #tpu.memory_space<vmem>>) attributes {dimension_semantics = [#tpu.dimension_semantics<parallel>], iteration_bounds = array<i64: 2>, scalar_prefetch = 0 : i64, scratch_operands = 2 : i64, tpu.core_type = #tpu.core_type<tc>, window_params = [{transform_indices = @transform_0, window_bounds = array<i64: 1, 4, 512>}, {transform_indices = @transform_1, window_bounds = array<i64: 1, 8, 384>}, {pipeline_mode = #tpu.pipeline_mode<synchronous>, transform_indices = @transform_2, window_bounds = array<i64: 1, 288>}, {pipeline_mode = #tpu.pipeline_mode<synchronous>, transform_indices = @transform_3, window_bounds = array<i64: 9, 8, 4>}, {pipeline_mode = #tpu.pipeline_mode<synchronous>, transform_indices = @transform_4, window_bounds = array<i64: 8, 1>}, {pipeline_mode = #tpu.pipeline_mode<synchronous>, transform_indices = @transform_5, window_bounds = array<i64: 9, 8, 8>}, {pipeline_mode = #tpu.pipeline_mode<synchronous>, transform_indices = @transform_6, window_bounds = array<i64: 8, 1>}, {pipeline_mode = #tpu.pipeline_mode<synchronous>, transform_indices = @transform_7, window_bounds = array<i64: 9, 8, 8>}, {pipeline_mode = #tpu.pipeline_mode<synchronous>, transform_indices = @transform_8, window_bounds = array<i64: 8, 1>}, {pipeline_mode = #tpu.pipeline_mode<synchronous>, transform_indices = @transform_9, window_bounds = array<i64: 9, 8, 8>}, {pipeline_mode = #tpu.pipeline_mode<synchronous>, transform_indices = @transform_10, window_bounds = array<i64: 8, 1>}, {pipeline_mode = #tpu.pipeline_mode<synchronous>, transform_indices = @transform_11, window_bounds = array<i64: 9, 8, 8>}, {pipeline_mode = #tpu.pipeline_mode<synchronous>, transform_indices = @transform_12, window_bounds = array<i64: 8, 1>}, {transform_indices = @transform_13, window_bounds = array<i64: 1, 8, 384>}]} {
    %cst = arith.constant 0.000000e+00 : f32
    %0 = vector.broadcast %cst : f32 to vector<8x128xf32>
    %cst_0 = arith.constant 0.000000e+00 : f32
    %1 = vector.broadcast %cst_0 : f32 to vector<8x96xf32>
    %c0 = arith.constant 0 : index
    %c0_1 = arith.constant 0 : index
    %2 = vector.load %arg15[%c0, %c0_1] : memref<8x512xf32, #tpu.memory_space<vmem>>, vector<8x128xf32>
    tpu.vector_store %arg15[%c0, %c0_1], %0 {strides = array<i32>} : memref<8x512xf32, #tpu.memory_space<vmem>>, vector<8x128xf32>,
    %c0_2 = arith.constant 0 : index
    %c0_3 = arith.constant 0 : index
    %3 = vector.load %arg16[%c0_2, %c0_3] : memref<8x512xf32, #tpu.memory_space<vmem>>, vector<8x128xf32>
    tpu.vector_store %arg16[%c0_2, %c0_3], %0 {strides = array<i32>} : memref<8x512xf32, #tpu.memory_space<vmem>>, vector<8x128xf32>,
    %c0_4 = arith.constant 0 : index
    %c416 = arith.constant 416 : index
    %4 = vector.load %arg15[%c0_4, %c416] : memref<8x512xf32, #tpu.memory_space<vmem>>, vector<8x96xf32>
    tpu.vector_store %arg15[%c0_4, %c416], %1 {strides = array<i32>} : memref<8x512xf32, #tpu.memory_space<vmem>>, vector<8x96xf32>,
    %c0_5 = arith.constant 0 : index
    %c416_6 = arith.constant 416 : index
    %5 = vector.load %arg16[%c0_5, %c416_6] : memref<8x512xf32, #tpu.memory_space<vmem>>, vector<8x96xf32>
    tpu.vector_store %arg16[%c0_5, %c416_6], %1 {strides = array<i32>} : memref<8x512xf32, #tpu.memory_space<vmem>>, vector<8x96xf32>,
    %c0_7 = arith.constant 0 : index
    %c0_8 = arith.constant 0 : index
    %6 = vector.load %arg3[%c0_7, %c0_8] : memref<1x288xf32, #tpu.memory_space<vmem>>, vector<1x288xf32>
    %c0_9 = arith.constant 0 : index
    %c0_10 = arith.constant 0 : index
    %c109 = arith.constant 109 : index
    %7 = vector.load %arg1[%c0_9, %c0_10, %c109] : memref<1x4x512xf32, #tpu.memory_space<vmem>>, vector<1x4x288xf32>
    %8 = vector.shape_cast %7 : vector<1x4x288xf32> to vector<4x288xf32>
    %c0_11 = arith.constant 0 : index
    %c0_12 = arith.constant 0 : index
    %c0_13 = arith.constant 0 : index
    %9 = vector.load %arg4[%c0_11, %c0_12, %c0_13] : memref<9x8x4xf32, #tpu.memory_space<vmem>>, vector<1x8x4xf32>
    %10 = vector.shape_cast %9 : vector<1x8x4xf32> to vector<8x4xf32>
    %cst_14 = arith.constant dense<0.000000e+00> : vector<8x288xf32>
    %11 = tpu.matmul %10, %8, %cst_14 {dimension_numbers = #tpu.dot_dimension_numbers<[1], [0], [0], [1], [0, 0, 1, 1], [], []>} : vector<8x4xf32>, vector<4x288xf32>, vector<8x288xf32> -> vector<8x288xf32>
    %c0_15 = arith.constant 0 : index
    %c0_16 = arith.constant 0 : index
    %c110 = arith.constant 110 : index
    %12 = vector.load %arg1[%c0_15, %c0_16, %c110] : memref<1x4x512xf32, #tpu.memory_space<vmem>>, vector<1x4x288xf32>
    %13 = vector.shape_cast %12 : vector<1x4x288xf32> to vector<4x288xf32>
    %c1 = arith.constant 1 : index
    %c0_17 = arith.constant 0 : index
    %c0_18 = arith.constant 0 : index
    %14 = vector.load %arg4[%c1, %c0_17, %c0_18] : memref<9x8x4xf32, #tpu.memory_space<vmem>>, vector<1x8x4xf32>
    %15 = vector.shape_cast %14 : vector<1x8x4xf32> to vector<8x4xf32>
    %cst_19 = arith.constant dense<0.000000e+00> : vector<8x288xf32>
    %16 = tpu.matmul %15, %13, %cst_19 {dimension_numbers = #tpu.dot_dimension_numbers<[1], [0], [0], [1], [0, 0, 1, 1], [], []>} : vector<8x4xf32>, vector<4x288xf32>, vector<8x288xf32> -> vector<8x288xf32>
    %c0_20 = arith.constant 0 : index
    %c0_21 = arith.constant 0 : index
    %c111 = arith.constant 111 : index
    %17 = vector.load %arg1[%c0_20, %c0_21, %c111] : memref<1x4x512xf32, #tpu.memory_space<vmem>>, vector<1x4x288xf32>
    %18 = vector.shape_cast %17 : vector<1x4x288xf32> to vector<4x288xf32>
    %c2 = arith.constant 2 : index
    %c0_22 = arith.constant 0 : index
    %c0_23 = arith.constant 0 : index
    %19 = vector.load %arg4[%c2, %c0_22, %c0_23] : memref<9x8x4xf32, #tpu.memory_space<vmem>>, vector<1x8x4xf32>
    %20 = vector.shape_cast %19 : vector<1x8x4xf32> to vector<8x4xf32>
    %cst_24 = arith.constant dense<0.000000e+00> : vector<8x288xf32>
    %21 = tpu.matmul %20, %18, %cst_24 {dimension_numbers = #tpu.dot_dimension_numbers<[1], [0], [0], [1], [0, 0, 1, 1], [], []>} : vector<8x4xf32>, vector<4x288xf32>, vector<8x288xf32> -> vector<8x288xf32>
    %c0_25 = arith.constant 0 : index
    %c0_26 = arith.constant 0 : index
    %c127 = arith.constant 127 : index
    %22 = vector.load %arg1[%c0_25, %c0_26, %c127] : memref<1x4x512xf32, #tpu.memory_space<vmem>>, vector<1x4x288xf32>
    %23 = vector.shape_cast %22 : vector<1x4x288xf32> to vector<4x288xf32>
    %c3 = arith.constant 3 : index
    %c0_27 = arith.constant 0 : index
    %c0_28 = arith.constant 0 : index
    %24 = vector.load %arg4[%c3, %c0_27, %c0_28] : memref<9x8x4xf32, #tpu.memory_space<vmem>>, vector<1x8x4xf32>
    %25 = vector.shape_cast %24 : vector<1x8x4xf32> to vector<8x4xf32>
    %cst_29 = arith.constant dense<0.000000e+00> : vector<8x288xf32>
    %26 = tpu.matmul %25, %23, %cst_29 {dimension_numbers = #tpu.dot_dimension_numbers<[1], [0], [0], [1], [0, 0, 1, 1], [], []>} : vector<8x4xf32>, vector<4x288xf32>, vector<8x288xf32> -> vector<8x288xf32>
    %c0_30 = arith.constant 0 : index
    %c0_31 = arith.constant 0 : index
    %c128 = arith.constant 128 : index
    %27 = vector.load %arg1[%c0_30, %c0_31, %c128] : memref<1x4x512xf32, #tpu.memory_space<vmem>>, vector<1x4x288xf32>
    %28 = vector.shape_cast %27 : vector<1x4x288xf32> to vector<4x288xf32>
    %c4 = arith.constant 4 : index
    %c0_32 = arith.constant 0 : index
    %c0_33 = arith.constant 0 : index
    %29 = vector.load %arg4[%c4, %c0_32, %c0_33] : memref<9x8x4xf32, #tpu.memory_space<vmem>>, vector<1x8x4xf32>
    %30 = vector.shape_cast %29 : vector<1x8x4xf32> to vector<8x4xf32>
    %cst_34 = arith.constant dense<0.000000e+00> : vector<8x288xf32>
    %31 = tpu.matmul %30, %28, %cst_34 {dimension_numbers = #tpu.dot_dimension_numbers<[1], [0], [0], [1], [0, 0, 1, 1], [], []>} : vector<8x4xf32>, vector<4x288xf32>, vector<8x288xf32> -> vector<8x288xf32>
    %c0_35 = arith.constant 0 : index
    %c0_36 = arith.constant 0 : index
    %c129 = arith.constant 129 : index
    %32 = vector.load %arg1[%c0_35, %c0_36, %c129] : memref<1x4x512xf32, #tpu.memory_space<vmem>>, vector<1x4x288xf32>
    %33 = vector.shape_cast %32 : vector<1x4x288xf32> to vector<4x288xf32>
    %c5 = arith.constant 5 : index
    %c0_37 = arith.constant 0 : index
    %c0_38 = arith.constant 0 : index
    %34 = vector.load %arg4[%c5, %c0_37, %c0_38] : memref<9x8x4xf32, #tpu.memory_space<vmem>>, vector<1x8x4xf32>
    %35 = vector.shape_cast %34 : vector<1x8x4xf32> to vector<8x4xf32>
    %cst_39 = arith.constant dense<0.000000e+00> : vector<8x288xf32>
    %36 = tpu.matmul %35, %33, %cst_39 {dimension_numbers = #tpu.dot_dimension_numbers<[1], [0], [0], [1], [0, 0, 1, 1], [], []>} : vector<8x4xf32>, vector<4x288xf32>, vector<8x288xf32> -> vector<8x288xf32>
    %c0_40 = arith.constant 0 : index
    %c0_41 = arith.constant 0 : index
    %c145 = arith.constant 145 : index
    %37 = vector.load %arg1[%c0_40, %c0_41, %c145] : memref<1x4x512xf32, #tpu.memory_space<vmem>>, vector<1x4x288xf32>
    %38 = vector.shape_cast %37 : vector<1x4x288xf32> to vector<4x288xf32>
    %c6 = arith.constant 6 : index
    %c0_42 = arith.constant 0 : index
    %c0_43 = arith.constant 0 : index
    %39 = vector.load %arg4[%c6, %c0_42, %c0_43] : memref<9x8x4xf32, #tpu.memory_space<vmem>>, vector<1x8x4xf32>
    %40 = vector.shape_cast %39 : vector<1x8x4xf32> to vector<8x4xf32>
    %cst_44 = arith.constant dense<0.000000e+00> : vector<8x288xf32>
    %41 = tpu.matmul %40, %38, %cst_44 {dimension_numbers = #tpu.dot_dimension_numbers<[1], [0], [0], [1], [0, 0, 1, 1], [], []>} : vector<8x4xf32>, vector<4x288xf32>, vector<8x288xf32> -> vector<8x288xf32>
    %c0_45 = arith.constant 0 : index
    %c0_46 = arith.constant 0 : index
    %c146 = arith.constant 146 : index
    %42 = vector.load %arg1[%c0_45, %c0_46, %c146] : memref<1x4x512xf32, #tpu.memory_space<vmem>>, vector<1x4x288xf32>
    %43 = vector.shape_cast %42 : vector<1x4x288xf32> to vector<4x288xf32>
    %c7 = arith.constant 7 : index
    %c0_47 = arith.constant 0 : index
    %c0_48 = arith.constant 0 : index
    %44 = vector.load %arg4[%c7, %c0_47, %c0_48] : memref<9x8x4xf32, #tpu.memory_space<vmem>>, vector<1x8x4xf32>
    %45 = vector.shape_cast %44 : vector<1x8x4xf32> to vector<8x4xf32>
    %cst_49 = arith.constant dense<0.000000e+00> : vector<8x288xf32>
    %46 = tpu.matmul %45, %43, %cst_49 {dimension_numbers = #tpu.dot_dimension_numbers<[1], [0], [0], [1], [0, 0, 1, 1], [], []>} : vector<8x4xf32>, vector<4x288xf32>, vector<8x288xf32> -> vector<8x288xf32>
    %c0_50 = arith.constant 0 : index
    %c0_51 = arith.constant 0 : index
    %c147 = arith.constant 147 : index
    %47 = vector.load %arg1[%c0_50, %c0_51, %c147] : memref<1x4x512xf32, #tpu.memory_space<vmem>>, vector<1x4x288xf32>
    %48 = vector.shape_cast %47 : vector<1x4x288xf32> to vector<4x288xf32>
    %c8 = arith.constant 8 : index
    %c0_52 = arith.constant 0 : index
    %c0_53 = arith.constant 0 : index
    %49 = vector.load %arg4[%c8, %c0_52, %c0_53] : memref<9x8x4xf32, #tpu.memory_space<vmem>>, vector<1x8x4xf32>
    %50 = vector.shape_cast %49 : vector<1x8x4xf32> to vector<8x4xf32>
    %cst_54 = arith.constant dense<0.000000e+00> : vector<8x288xf32>
    %51 = tpu.matmul %50, %48, %cst_54 {dimension_numbers = #tpu.dot_dimension_numbers<[1], [0], [0], [1], [0, 0, 1, 1], [], []>} : vector<8x4xf32>, vector<4x288xf32>, vector<8x288xf32> -> vector<8x288xf32>
    %52 = arith.addf %11, %16 : vector<8x288xf32>
    %53 = arith.addf %21, %26 : vector<8x288xf32>
    %54 = arith.addf %31, %36 : vector<8x288xf32>
    %55 = arith.addf %41, %46 : vector<8x288xf32>
    %56 = arith.addf %52, %53 : vector<8x288xf32>
    %57 = arith.addf %54, %55 : vector<8x288xf32>
    %58 = arith.addf %56, %57 : vector<8x288xf32>
    %59 = arith.addf %58, %51 : vector<8x288xf32>
    %c0_55 = arith.constant 0 : index
    %c0_56 = arith.constant 0 : index
    %60 = vector.load %arg5[%c0_55, %c0_56] : memref<8x1xf32, #tpu.memory_space<vmem>>, vector<8x1xf32>
    %61 = vector.broadcast %60 : vector<8x1xf32> to vector<8x288xf32>
    %62 = arith.addf %59, %61 : vector<8x288xf32>
    %cst_57 = arith.constant 0.000000e+00 : f32
    %63 = vector.broadcast %cst_57 : f32 to vector<8x288xf32>
    %64 = arith.maximumf %62, %63 : vector<8x288xf32>
    %65 = vector.broadcast %6 : vector<1x288xf32> to vector<8x288xf32>
    %66 = arith.mulf %64, %65 : vector<8x288xf32>
    %c0_58 = arith.constant 0 : index
    %c128_59 = arith.constant 128 : index
    %67 = vector.load %arg16[%c0_58, %c128_59] : memref<8x512xf32, #tpu.memory_space<vmem>>, vector<8x288xf32>
    tpu.vector_store %arg16[%c0_58, %c128_59], %66 {strides = array<i32>} : memref<8x512xf32, #tpu.memory_space<vmem>>, vector<8x288xf32>,
    %c0_60 = arith.constant 0 : index
    %c109_61 = arith.constant 109 : index
    %68 = vector.load %arg16[%c0_60, %c109_61] : memref<8x512xf32, #tpu.memory_space<vmem>>, vector<8x288xf32>
    %c0_62 = arith.constant 0 : index
    %c0_63 = arith.constant 0 : index
    %c0_64 = arith.constant 0 : index
    %69 = vector.load %arg6[%c0_62, %c0_63, %c0_64] : memref<9x8x8xf32, #tpu.memory_space<vmem>>, vector<1x8x8xf32>
    %70 = vector.shape_cast %69 : vector<1x8x8xf32> to vector<8x8xf32>
    %cst_65 = arith.constant dense<0.000000e+00> : vector<8x288xf32>
    %71 = tpu.matmul %70, %68, %cst_65 {dimension_numbers = #tpu.dot_dimension_numbers<[1], [0], [0], [1], [0, 0, 1, 1], [], []>} : vector<8x8xf32>, vector<8x288xf32>, vector<8x288xf32> -> vector<8x288xf32>
    %c0_66 = arith.constant 0 : index
    %c110_67 = arith.constant 110 : index
    %72 = vector.load %arg16[%c0_66, %c110_67] : memref<8x512xf32, #tpu.memory_space<vmem>>, vector<8x288xf32>
    %c1_68 = arith.constant 1 : index
    %c0_69 = arith.constant 0 : index
    %c0_70 = arith.constant 0 : index
    %73 = vector.load %arg6[%c1_68, %c0_69, %c0_70] : memref<9x8x8xf32, #tpu.memory_space<vmem>>, vector<1x8x8xf32>
    %74 = vector.shape_cast %73 : vector<1x8x8xf32> to vector<8x8xf32>
    %cst_71 = arith.constant dense<0.000000e+00> : vector<8x288xf32>
    %75 = tpu.matmul %74, %72, %cst_71 {dimension_numbers = #tpu.dot_dimension_numbers<[1], [0], [0], [1], [0, 0, 1, 1], [], []>} : vector<8x8xf32>, vector<8x288xf32>, vector<8x288xf32> -> vector<8x288xf32>
    %c0_72 = arith.constant 0 : index
    %c111_73 = arith.constant 111 : index
    %76 = vector.load %arg16[%c0_72, %c111_73] : memref<8x512xf32, #tpu.memory_space<vmem>>, vector<8x288xf32>
    %c2_74 = arith.constant 2 : index
    %c0_75 = arith.constant 0 : index
    %c0_76 = arith.constant 0 : index
    %77 = vector.load %arg6[%c2_74, %c0_75, %c0_76] : memref<9x8x8xf32, #tpu.memory_space<vmem>>, vector<1x8x8xf32>
    %78 = vector.shape_cast %77 : vector<1x8x8xf32> to vector<8x8xf32>
    %cst_77 = arith.constant dense<0.000000e+00> : vector<8x288xf32>
    %79 = tpu.matmul %78, %76, %cst_77 {dimension_numbers = #tpu.dot_dimension_numbers<[1], [0], [0], [1], [0, 0, 1, 1], [], []>} : vector<8x8xf32>, vector<8x288xf32>, vector<8x288xf32> -> vector<8x288xf32>
    %c0_78 = arith.constant 0 : index
    %c127_79 = arith.constant 127 : index
    %80 = vector.load %arg16[%c0_78, %c127_79] : memref<8x512xf32, #tpu.memory_space<vmem>>, vector<8x288xf32>
    %c3_80 = arith.constant 3 : index
    %c0_81 = arith.constant 0 : index
    %c0_82 = arith.constant 0 : index
    %81 = vector.load %arg6[%c3_80, %c0_81, %c0_82] : memref<9x8x8xf32, #tpu.memory_space<vmem>>, vector<1x8x8xf32>
    %82 = vector.shape_cast %81 : vector<1x8x8xf32> to vector<8x8xf32>
    %cst_83 = arith.constant dense<0.000000e+00> : vector<8x288xf32>
    %83 = tpu.matmul %82, %80, %cst_83 {dimension_numbers = #tpu.dot_dimension_numbers<[1], [0], [0], [1], [0, 0, 1, 1], [], []>} : vector<8x8xf32>, vector<8x288xf32>, vector<8x288xf32> -> vector<8x288xf32>
    %c0_84 = arith.constant 0 : index
    %c128_85 = arith.constant 128 : index
    %84 = vector.load %arg16[%c0_84, %c128_85] : memref<8x512xf32, #tpu.memory_space<vmem>>, vector<8x288xf32>
    %c4_86 = arith.constant 4 : index
    %c0_87 = arith.constant 0 : index
    %c0_88 = arith.constant 0 : index
    %85 = vector.load %arg6[%c4_86, %c0_87, %c0_88] : memref<9x8x8xf32, #tpu.memory_space<vmem>>, vector<1x8x8xf32>
    %86 = vector.shape_cast %85 : vector<1x8x8xf32> to vector<8x8xf32>
    %cst_89 = arith.constant dense<0.000000e+00> : vector<8x288xf32>
    %87 = tpu.matmul %86, %84, %cst_89 {dimension_numbers = #tpu.dot_dimension_numbers<[1], [0], [0], [1], [0, 0, 1, 1], [], []>} : vector<8x8xf32>, vector<8x288xf32>, vector<8x288xf32> -> vector<8x288xf32>
    %c0_90 = arith.constant 0 : index
    %c129_91 = arith.constant 129 : index
    %88 = vector.load %arg16[%c0_90, %c129_91] : memref<8x512xf32, #tpu.memory_space<vmem>>, vector<8x288xf32>
    %c5_92 = arith.constant 5 : index
    %c0_93 = arith.constant 0 : index
    %c0_94 = arith.constant 0 : index
    %89 = vector.load %arg6[%c5_92, %c0_93, %c0_94] : memref<9x8x8xf32, #tpu.memory_space<vmem>>, vector<1x8x8xf32>
    %90 = vector.shape_cast %89 : vector<1x8x8xf32> to vector<8x8xf32>
    %cst_95 = arith.constant dense<0.000000e+00> : vector<8x288xf32>
    %91 = tpu.matmul %90, %88, %cst_95 {dimension_numbers = #tpu.dot_dimension_numbers<[1], [0], [0], [1], [0, 0, 1, 1], [], []>} : vector<8x8xf32>, vector<8x288xf32>, vector<8x288xf32> -> vector<8x288xf32>
    %c0_96 = arith.constant 0 : index
    %c145_97 = arith.constant 145 : index
    %92 = vector.load %arg16[%c0_96, %c145_97] : memref<8x512xf32, #tpu.memory_space<vmem>>, vector<8x288xf32>
    %c6_98 = arith.constant 6 : index
    %c0_99 = arith.constant 0 : index
    %c0_100 = arith.constant 0 : index
    %93 = vector.load %arg6[%c6_98, %c0_99, %c0_100] : memref<9x8x8xf32, #tpu.memory_space<vmem>>, vector<1x8x8xf32>
    %94 = vector.shape_cast %93 : vector<1x8x8xf32> to vector<8x8xf32>
    %cst_101 = arith.constant dense<0.000000e+00> : vector<8x288xf32>
    %95 = tpu.matmul %94, %92, %cst_101 {dimension_numbers = #tpu.dot_dimension_numbers<[1], [0], [0], [1], [0, 0, 1, 1], [], []>} : vector<8x8xf32>, vector<8x288xf32>, vector<8x288xf32> -> vector<8x288xf32>
    %c0_102 = arith.constant 0 : index
    %c146_103 = arith.constant 146 : index
    %96 = vector.load %arg16[%c0_102, %c146_103] : memref<8x512xf32, #tpu.memory_space<vmem>>, vector<8x288xf32>
    %c7_104 = arith.constant 7 : index
    %c0_105 = arith.constant 0 : index
    %c0_106 = arith.constant 0 : index
    %97 = vector.load %arg6[%c7_104, %c0_105, %c0_106] : memref<9x8x8xf32, #tpu.memory_space<vmem>>, vector<1x8x8xf32>
    %98 = vector.shape_cast %97 : vector<1x8x8xf32> to vector<8x8xf32>
    %cst_107 = arith.constant dense<0.000000e+00> : vector<8x288xf32>
    %99 = tpu.matmul %98, %96, %cst_107 {dimension_numbers = #tpu.dot_dimension_numbers<[1], [0], [0], [1], [0, 0, 1, 1], [], []>} : vector<8x8xf32>, vector<8x288xf32>, vector<8x288xf32> -> vector<8x288xf32>
    %c0_108 = arith.constant 0 : index
    %c147_109 = arith.constant 147 : index
    %100 = vector.load %arg16[%c0_108, %c147_109] : memref<8x512xf32, #tpu.memory_space<vmem>>, vector<8x288xf32>
    %c8_110 = arith.constant 8 : index
    %c0_111 = arith.constant 0 : index
    %c0_112 = arith.constant 0 : index
    %101 = vector.load %arg6[%c8_110, %c0_111, %c0_112] : memref<9x8x8xf32, #tpu.memory_space<vmem>>, vector<1x8x8xf32>
    %102 = vector.shape_cast %101 : vector<1x8x8xf32> to vector<8x8xf32>
    %cst_113 = arith.constant dense<0.000000e+00> : vector<8x288xf32>
    %103 = tpu.matmul %102, %100, %cst_113 {dimension_numbers = #tpu.dot_dimension_numbers<[1], [0], [0], [1], [0, 0, 1, 1], [], []>} : vector<8x8xf32>, vector<8x288xf32>, vector<8x288xf32> -> vector<8x288xf32>
    %104 = arith.addf %71, %75 : vector<8x288xf32>
    %105 = arith.addf %79, %83 : vector<8x288xf32>
    %106 = arith.addf %87, %91 : vector<8x288xf32>
    %107 = arith.addf %95, %99 : vector<8x288xf32>
    %108 = arith.addf %104, %105 : vector<8x288xf32>
    %109 = arith.addf %106, %107 : vector<8x288xf32>
    %110 = arith.addf %108, %109 : vector<8x288xf32>
    %111 = arith.addf %110, %103 : vector<8x288xf32>
    %c0_114 = arith.constant 0 : index
    %c0_115 = arith.constant 0 : index
    %112 = vector.load %arg7[%c0_114, %c0_115] : memref<8x1xf32, #tpu.memory_space<vmem>>, vector<8x1xf32>
    %113 = vector.broadcast %112 : vector<8x1xf32> to vector<8x288xf32>
    %114 = arith.addf %111, %113 : vector<8x288xf32>
    %cst_116 = arith.constant 0.000000e+00 : f32
    %115 = vector.broadcast %cst_116 : f32 to vector<8x288xf32>
    %116 = arith.maximumf %114, %115 : vector<8x288xf32>
    %117 = vector.broadcast %6 : vector<1x288xf32> to vector<8x288xf32>
    %118 = arith.mulf %116, %117 : vector<8x288xf32>
    %c0_117 = arith.constant 0 : index
    %c128_118 = arith.constant 128 : index
    %119 = vector.load %arg15[%c0_117, %c128_118] : memref<8x512xf32, #tpu.memory_space<vmem>>, vector<8x288xf32>
    tpu.vector_store %arg15[%c0_117, %c128_118], %118 {strides = array<i32>} : memref<8x512xf32, #tpu.memory_space<vmem>>, vector<8x288xf32>,
    %c0_119 = arith.constant 0 : index
    %c109_120 = arith.constant 109 : index
    %120 = vector.load %arg15[%c0_119, %c109_120] : memref<8x512xf32, #tpu.memory_space<vmem>>, vector<8x288xf32>
    %c0_121 = arith.constant 0 : index
    %c0_122 = arith.constant 0 : index
    %c0_123 = arith.constant 0 : index
    %121 = vector.load %arg8[%c0_121, %c0_122, %c0_123] : memref<9x8x8xf32, #tpu.memory_space<vmem>>, vector<1x8x8xf32>
    %122 = vector.shape_cast %121 : vector<1x8x8xf32> to vector<8x8xf32>
    %cst_124 = arith.constant dense<0.000000e+00> : vector<8x288xf32>
    %123 = tpu.matmul %122, %120, %cst_124 {dimension_numbers = #tpu.dot_dimension_numbers<[1], [0], [0], [1], [0, 0, 1, 1], [], []>} : vector<8x8xf32>, vector<8x288xf32>, vector<8x288xf32> -> vector<8x288xf32>
    %c0_125 = arith.constant 0 : index
    %c110_126 = arith.constant 110 : index
    %124 = vector.load %arg15[%c0_125, %c110_126] : memref<8x512xf32, #tpu.memory_space<vmem>>, vector<8x288xf32>
    %c1_127 = arith.constant 1 : index
    %c0_128 = arith.constant 0 : index
    %c0_129 = arith.constant 0 : index
    %125 = vector.load %arg8[%c1_127, %c0_128, %c0_129] : memref<9x8x8xf32, #tpu.memory_space<vmem>>, vector<1x8x8xf32>
    %126 = vector.shape_cast %125 : vector<1x8x8xf32> to vector<8x8xf32>
    %cst_130 = arith.constant dense<0.000000e+00> : vector<8x288xf32>
    %127 = tpu.matmul %126, %124, %cst_130 {dimension_numbers = #tpu.dot_dimension_numbers<[1], [0], [0], [1], [0, 0, 1, 1], [], []>} : vector<8x8xf32>, vector<8x288xf32>, vector<8x288xf32> -> vector<8x288xf32>
    %c0_131 = arith.constant 0 : index
    %c111_132 = arith.constant 111 : index
    %128 = vector.load %arg15[%c0_131, %c111_132] : memref<8x512xf32, #tpu.memory_space<vmem>>, vector<8x288xf32>
    %c2_133 = arith.constant 2 : index
    %c0_134 = arith.constant 0 : index
    %c0_135 = arith.constant 0 : index
    %129 = vector.load %arg8[%c2_133, %c0_134, %c0_135] : memref<9x8x8xf32, #tpu.memory_space<vmem>>, vector<1x8x8xf32>
    %130 = vector.shape_cast %129 : vector<1x8x8xf32> to vector<8x8xf32>
    %cst_136 = arith.constant dense<0.000000e+00> : vector<8x288xf32>
    %131 = tpu.matmul %130, %128, %cst_136 {dimension_numbers = #tpu.dot_dimension_numbers<[1], [0], [0], [1], [0, 0, 1, 1], [], []>} : vector<8x8xf32>, vector<8x288xf32>, vector<8x288xf32> -> vector<8x288xf32>
    %c0_137 = arith.constant 0 : index
    %c127_138 = arith.constant 127 : index
    %132 = vector.load %arg15[%c0_137, %c127_138] : memref<8x512xf32, #tpu.memory_space<vmem>>, vector<8x288xf32>
    %c3_139 = arith.constant 3 : index
    %c0_140 = arith.constant 0 : index
    %c0_141 = arith.constant 0 : index
    %133 = vector.load %arg8[%c3_139, %c0_140, %c0_141] : memref<9x8x8xf32, #tpu.memory_space<vmem>>, vector<1x8x8xf32>
    %134 = vector.shape_cast %133 : vector<1x8x8xf32> to vector<8x8xf32>
    %cst_142 = arith.constant dense<0.000000e+00> : vector<8x288xf32>
    %135 = tpu.matmul %134, %132, %cst_142 {dimension_numbers = #tpu.dot_dimension_numbers<[1], [0], [0], [1], [0, 0, 1, 1], [], []>} : vector<8x8xf32>, vector<8x288xf32>, vector<8x288xf32> -> vector<8x288xf32>
    %c0_143 = arith.constant 0 : index
    %c128_144 = arith.constant 128 : index
    %136 = vector.load %arg15[%c0_143, %c128_144] : memref<8x512xf32, #tpu.memory_space<vmem>>, vector<8x288xf32>
    %c4_145 = arith.constant 4 : index
    %c0_146 = arith.constant 0 : index
    %c0_147 = arith.constant 0 : index
    %137 = vector.load %arg8[%c4_145, %c0_146, %c0_147] : memref<9x8x8xf32, #tpu.memory_space<vmem>>, vector<1x8x8xf32>
    %138 = vector.shape_cast %137 : vector<1x8x8xf32> to vector<8x8xf32>
    %cst_148 = arith.constant dense<0.000000e+00> : vector<8x288xf32>
    %139 = tpu.matmul %138, %136, %cst_148 {dimension_numbers = #tpu.dot_dimension_numbers<[1], [0], [0], [1], [0, 0, 1, 1], [], []>} : vector<8x8xf32>, vector<8x288xf32>, vector<8x288xf32> -> vector<8x288xf32>
    %c0_149 = arith.constant 0 : index
    %c129_150 = arith.constant 129 : index
    %140 = vector.load %arg15[%c0_149, %c129_150] : memref<8x512xf32, #tpu.memory_space<vmem>>, vector<8x288xf32>
    %c5_151 = arith.constant 5 : index
    %c0_152 = arith.constant 0 : index
    %c0_153 = arith.constant 0 : index
    %141 = vector.load %arg8[%c5_151, %c0_152, %c0_153] : memref<9x8x8xf32, #tpu.memory_space<vmem>>, vector<1x8x8xf32>
    %142 = vector.shape_cast %141 : vector<1x8x8xf32> to vector<8x8xf32>
    %cst_154 = arith.constant dense<0.000000e+00> : vector<8x288xf32>
    %143 = tpu.matmul %142, %140, %cst_154 {dimension_numbers = #tpu.dot_dimension_numbers<[1], [0], [0], [1], [0, 0, 1, 1], [], []>} : vector<8x8xf32>, vector<8x288xf32>, vector<8x288xf32> -> vector<8x288xf32>
    %c0_155 = arith.constant 0 : index
    %c145_156 = arith.constant 145 : index
    %144 = vector.load %arg15[%c0_155, %c145_156] : memref<8x512xf32, #tpu.memory_space<vmem>>, vector<8x288xf32>
    %c6_157 = arith.constant 6 : index
    %c0_158 = arith.constant 0 : index
    %c0_159 = arith.constant 0 : index
    %145 = vector.load %arg8[%c6_157, %c0_158, %c0_159] : memref<9x8x8xf32, #tpu.memory_space<vmem>>, vector<1x8x8xf32>
    %146 = vector.shape_cast %145 : vector<1x8x8xf32> to vector<8x8xf32>
    %cst_160 = arith.constant dense<0.000000e+00> : vector<8x288xf32>
    %147 = tpu.matmul %146, %144, %cst_160 {dimension_numbers = #tpu.dot_dimension_numbers<[1], [0], [0], [1], [0, 0, 1, 1], [], []>} : vector<8x8xf32>, vector<8x288xf32>, vector<8x288xf32> -> vector<8x288xf32>
    %c0_161 = arith.constant 0 : index
    %c146_162 = arith.constant 146 : index
    %148 = vector.load %arg15[%c0_161, %c146_162] : memref<8x512xf32, #tpu.memory_space<vmem>>, vector<8x288xf32>
    %c7_163 = arith.constant 7 : index
    %c0_164 = arith.constant 0 : index
    %c0_165 = arith.constant 0 : index
    %149 = vector.load %arg8[%c7_163, %c0_164, %c0_165] : memref<9x8x8xf32, #tpu.memory_space<vmem>>, vector<1x8x8xf32>
    %150 = vector.shape_cast %149 : vector<1x8x8xf32> to vector<8x8xf32>
    %cst_166 = arith.constant dense<0.000000e+00> : vector<8x288xf32>
    %151 = tpu.matmul %150, %148, %cst_166 {dimension_numbers = #tpu.dot_dimension_numbers<[1], [0], [0], [1], [0, 0, 1, 1], [], []>} : vector<8x8xf32>, vector<8x288xf32>, vector<8x288xf32> -> vector<8x288xf32>
    %c0_167 = arith.constant 0 : index
    %c147_168 = arith.constant 147 : index
    %152 = vector.load %arg15[%c0_167, %c147_168] : memref<8x512xf32, #tpu.memory_space<vmem>>, vector<8x288xf32>
    %c8_169 = arith.constant 8 : index
    %c0_170 = arith.constant 0 : index
    %c0_171 = arith.constant 0 : index
    %153 = vector.load %arg8[%c8_169, %c0_170, %c0_171] : memref<9x8x8xf32, #tpu.memory_space<vmem>>, vector<1x8x8xf32>
    %154 = vector.shape_cast %153 : vector<1x8x8xf32> to vector<8x8xf32>
    %cst_172 = arith.constant dense<0.000000e+00> : vector<8x288xf32>
    %155 = tpu.matmul %154, %152, %cst_172 {dimension_numbers = #tpu.dot_dimension_numbers<[1], [0], [0], [1], [0, 0, 1, 1], [], []>} : vector<8x8xf32>, vector<8x288xf32>, vector<8x288xf32> -> vector<8x288xf32>
    %156 = arith.addf %123, %127 : vector<8x288xf32>
    %157 = arith.addf %131, %135 : vector<8x288xf32>
    %158 = arith.addf %139, %143 : vector<8x288xf32>
    %159 = arith.addf %147, %151 : vector<8x288xf32>
    %160 = arith.addf %156, %157 : vector<8x288xf32>
    %161 = arith.addf %158, %159 : vector<8x288xf32>
    %162 = arith.addf %160, %161 : vector<8x288xf32>
    %163 = arith.addf %162, %155 : vector<8x288xf32>
    %c0_173 = arith.constant 0 : index
    %c0_174 = arith.constant 0 : index
    %164 = vector.load %arg9[%c0_173, %c0_174] : memref<8x1xf32, #tpu.memory_space<vmem>>, vector<8x1xf32>
    %165 = vector.broadcast %164 : vector<8x1xf32> to vector<8x288xf32>
    %166 = arith.addf %163, %165 : vector<8x288xf32>
    %167 = arith.addf %62, %166 : vector<8x288xf32>
    %c0_175 = arith.constant 0 : index
    %c0_176 = arith.constant 0 : index
    %c0_177 = arith.constant 0 : index
    %168 = vector.load %arg2[%c0_175, %c0_176, %c0_177] : memref<1x8x384xf32, #tpu.memory_space<vmem>>, vector<1x8x288xf32>
    %169 = vector.shape_cast %168 : vector<1x8x288xf32> to vector<8x288xf32>
    %170 = arith.addf %167, %169 : vector<8x288xf32>
    %cst_178 = arith.constant 0.000000e+00 : f32
    %171 = vector.broadcast %cst_178 : f32 to vector<8x288xf32>
    %172 = arith.maximumf %170, %171 : vector<8x288xf32>
    %173 = vector.broadcast %6 : vector<1x288xf32> to vector<8x288xf32>
    %174 = arith.mulf %172, %173 : vector<8x288xf32>
    %c0_179 = arith.constant 0 : index
    %c128_180 = arith.constant 128 : index
    %175 = vector.load %arg16[%c0_179, %c128_180] : memref<8x512xf32, #tpu.memory_space<vmem>>, vector<8x288xf32>
    tpu.vector_store %arg16[%c0_179, %c128_180], %174 {strides = array<i32>} : memref<8x512xf32, #tpu.memory_space<vmem>>, vector<8x288xf32>,
    %c0_181 = arith.constant 0 : index
    %c109_182 = arith.constant 109 : index
    %176 = vector.load %arg16[%c0_181, %c109_182] : memref<8x512xf32, #tpu.memory_space<vmem>>, vector<8x288xf32>
    %c0_183 = arith.constant 0 : index
    %c0_184 = arith.constant 0 : index
    %c0_185 = arith.constant 0 : index
    %177 = vector.load %arg10[%c0_183, %c0_184, %c0_185] : memref<9x8x8xf32, #tpu.memory_space<vmem>>, vector<1x8x8xf32>
    %178 = vector.shape_cast %177 : vector<1x8x8xf32> to vector<8x8xf32>
    %cst_186 = arith.constant dense<0.000000e+00> : vector<8x288xf32>
    %179 = tpu.matmul %178, %176, %cst_186 {dimension_numbers = #tpu.dot_dimension_numbers<[1], [0], [0], [1], [0, 0, 1, 1], [], []>} : vector<8x8xf32>, vector<8x288xf32>, vector<8x288xf32> -> vector<8x288xf32>
    %c0_187 = arith.constant 0 : index
    %c110_188 = arith.constant 110 : index
    %180 = vector.load %arg16[%c0_187, %c110_188] : memref<8x512xf32, #tpu.memory_space<vmem>>, vector<8x288xf32>
    %c1_189 = arith.constant 1 : index
    %c0_190 = arith.constant 0 : index
    %c0_191 = arith.constant 0 : index
    %181 = vector.load %arg10[%c1_189, %c0_190, %c0_191] : memref<9x8x8xf32, #tpu.memory_space<vmem>>, vector<1x8x8xf32>
    %182 = vector.shape_cast %181 : vector<1x8x8xf32> to vector<8x8xf32>
    %cst_192 = arith.constant dense<0.000000e+00> : vector<8x288xf32>
    %183 = tpu.matmul %182, %180, %cst_192 {dimension_numbers = #tpu.dot_dimension_numbers<[1], [0], [0], [1], [0, 0, 1, 1], [], []>} : vector<8x8xf32>, vector<8x288xf32>, vector<8x288xf32> -> vector<8x288xf32>
    %c0_193 = arith.constant 0 : index
    %c111_194 = arith.constant 111 : index
    %184 = vector.load %arg16[%c0_193, %c111_194] : memref<8x512xf32, #tpu.memory_space<vmem>>, vector<8x288xf32>
    %c2_195 = arith.constant 2 : index
    %c0_196 = arith.constant 0 : index
    %c0_197 = arith.constant 0 : index
    %185 = vector.load %arg10[%c2_195, %c0_196, %c0_197] : memref<9x8x8xf32, #tpu.memory_space<vmem>>, vector<1x8x8xf32>
    %186 = vector.shape_cast %185 : vector<1x8x8xf32> to vector<8x8xf32>
    %cst_198 = arith.constant dense<0.000000e+00> : vector<8x288xf32>
    %187 = tpu.matmul %186, %184, %cst_198 {dimension_numbers = #tpu.dot_dimension_numbers<[1], [0], [0], [1], [0, 0, 1, 1], [], []>} : vector<8x8xf32>, vector<8x288xf32>, vector<8x288xf32> -> vector<8x288xf32>
    %c0_199 = arith.constant 0 : index
    %c127_200 = arith.constant 127 : index
    %188 = vector.load %arg16[%c0_199, %c127_200] : memref<8x512xf32, #tpu.memory_space<vmem>>, vector<8x288xf32>
    %c3_201 = arith.constant 3 : index
    %c0_202 = arith.constant 0 : index
    %c0_203 = arith.constant 0 : index
    %189 = vector.load %arg10[%c3_201, %c0_202, %c0_203] : memref<9x8x8xf32, #tpu.memory_space<vmem>>, vector<1x8x8xf32>
    %190 = vector.shape_cast %189 : vector<1x8x8xf32> to vector<8x8xf32>
    %cst_204 = arith.constant dense<0.000000e+00> : vector<8x288xf32>
    %191 = tpu.matmul %190, %188, %cst_204 {dimension_numbers = #tpu.dot_dimension_numbers<[1], [0], [0], [1], [0, 0, 1, 1], [], []>} : vector<8x8xf32>, vector<8x288xf32>, vector<8x288xf32> -> vector<8x288xf32>
    %c0_205 = arith.constant 0 : index
    %c128_206 = arith.constant 128 : index
    %192 = vector.load %arg16[%c0_205, %c128_206] : memref<8x512xf32, #tpu.memory_space<vmem>>, vector<8x288xf32>
    %c4_207 = arith.constant 4 : index
    %c0_208 = arith.constant 0 : index
    %c0_209 = arith.constant 0 : index
    %193 = vector.load %arg10[%c4_207, %c0_208, %c0_209] : memref<9x8x8xf32, #tpu.memory_space<vmem>>, vector<1x8x8xf32>
    %194 = vector.shape_cast %193 : vector<1x8x8xf32> to vector<8x8xf32>
    %cst_210 = arith.constant dense<0.000000e+00> : vector<8x288xf32>
    %195 = tpu.matmul %194, %192, %cst_210 {dimension_numbers = #tpu.dot_dimension_numbers<[1], [0], [0], [1], [0, 0, 1, 1], [], []>} : vector<8x8xf32>, vector<8x288xf32>, vector<8x288xf32> -> vector<8x288xf32>
    %c0_211 = arith.constant 0 : index
    %c129_212 = arith.constant 129 : index
    %196 = vector.load %arg16[%c0_211, %c129_212] : memref<8x512xf32, #tpu.memory_space<vmem>>, vector<8x288xf32>
    %c5_213 = arith.constant 5 : index
    %c0_214 = arith.constant 0 : index
    %c0_215 = arith.constant 0 : index
    %197 = vector.load %arg10[%c5_213, %c0_214, %c0_215] : memref<9x8x8xf32, #tpu.memory_space<vmem>>, vector<1x8x8xf32>
    %198 = vector.shape_cast %197 : vector<1x8x8xf32> to vector<8x8xf32>
    %cst_216 = arith.constant dense<0.000000e+00> : vector<8x288xf32>
    %199 = tpu.matmul %198, %196, %cst_216 {dimension_numbers = #tpu.dot_dimension_numbers<[1], [0], [0], [1], [0, 0, 1, 1], [], []>} : vector<8x8xf32>, vector<8x288xf32>, vector<8x288xf32> -> vector<8x288xf32>
    %c0_217 = arith.constant 0 : index
    %c145_218 = arith.constant 145 : index
    %200 = vector.load %arg16[%c0_217, %c145_218] : memref<8x512xf32, #tpu.memory_space<vmem>>, vector<8x288xf32>
    %c6_219 = arith.constant 6 : index
    %c0_220 = arith.constant 0 : index
    %c0_221 = arith.constant 0 : index
    %201 = vector.load %arg10[%c6_219, %c0_220, %c0_221] : memref<9x8x8xf32, #tpu.memory_space<vmem>>, vector<1x8x8xf32>
    %202 = vector.shape_cast %201 : vector<1x8x8xf32> to vector<8x8xf32>
    %cst_222 = arith.constant dense<0.000000e+00> : vector<8x288xf32>
    %203 = tpu.matmul %202, %200, %cst_222 {dimension_numbers = #tpu.dot_dimension_numbers<[1], [0], [0], [1], [0, 0, 1, 1], [], []>} : vector<8x8xf32>, vector<8x288xf32>, vector<8x288xf32> -> vector<8x288xf32>
    %c0_223 = arith.constant 0 : index
    %c146_224 = arith.constant 146 : index
    %204 = vector.load %arg16[%c0_223, %c146_224] : memref<8x512xf32, #tpu.memory_space<vmem>>, vector<8x288xf32>
    %c7_225 = arith.constant 7 : index
    %c0_226 = arith.constant 0 : index
    %c0_227 = arith.constant 0 : index
    %205 = vector.load %arg10[%c7_225, %c0_226, %c0_227] : memref<9x8x8xf32, #tpu.memory_space<vmem>>, vector<1x8x8xf32>
    %206 = vector.shape_cast %205 : vector<1x8x8xf32> to vector<8x8xf32>
    %cst_228 = arith.constant dense<0.000000e+00> : vector<8x288xf32>
    %207 = tpu.matmul %206, %204, %cst_228 {dimension_numbers = #tpu.dot_dimension_numbers<[1], [0], [0], [1], [0, 0, 1, 1], [], []>} : vector<8x8xf32>, vector<8x288xf32>, vector<8x288xf32> -> vector<8x288xf32>
    %c0_229 = arith.constant 0 : index
    %c147_230 = arith.constant 147 : index
    %208 = vector.load %arg16[%c0_229, %c147_230] : memref<8x512xf32, #tpu.memory_space<vmem>>, vector<8x288xf32>
    %c8_231 = arith.constant 8 : index
    %c0_232 = arith.constant 0 : index
    %c0_233 = arith.constant 0 : index
    %209 = vector.load %arg10[%c8_231, %c0_232, %c0_233] : memref<9x8x8xf32, #tpu.memory_space<vmem>>, vector<1x8x8xf32>
    %210 = vector.shape_cast %209 : vector<1x8x8xf32> to vector<8x8xf32>
    %cst_234 = arith.constant dense<0.000000e+00> : vector<8x288xf32>
    %211 = tpu.matmul %210, %208, %cst_234 {dimension_numbers = #tpu.dot_dimension_numbers<[1], [0], [0], [1], [0, 0, 1, 1], [], []>} : vector<8x8xf32>, vector<8x288xf32>, vector<8x288xf32> -> vector<8x288xf32>
    %212 = arith.addf %179, %183 : vector<8x288xf32>
    %213 = arith.addf %187, %191 : vector<8x288xf32>
    %214 = arith.addf %195, %199 : vector<8x288xf32>
    %215 = arith.addf %203, %207 : vector<8x288xf32>
    %216 = arith.addf %212, %213 : vector<8x288xf32>
    %217 = arith.addf %214, %215 : vector<8x288xf32>
    %218 = arith.addf %216, %217 : vector<8x288xf32>
    %219 = arith.addf %218, %211 : vector<8x288xf32>
    %c0_235 = arith.constant 0 : index
    %c0_236 = arith.constant 0 : index
    %220 = vector.load %arg11[%c0_235, %c0_236] : memref<8x1xf32, #tpu.memory_space<vmem>>, vector<8x1xf32>
    %221 = vector.broadcast %220 : vector<8x1xf32> to vector<8x288xf32>
    %222 = arith.addf %219, %221 : vector<8x288xf32>
    %cst_237 = arith.constant 0.000000e+00 : f32
    %223 = vector.broadcast %cst_237 : f32 to vector<8x288xf32>
    %224 = arith.maximumf %222, %223 : vector<8x288xf32>
    %225 = vector.broadcast %6 : vector<1x288xf32> to vector<8x288xf32>
    %226 = arith.mulf %224, %225 : vector<8x288xf32>
    %c0_238 = arith.constant 0 : index
    %c128_239 = arith.constant 128 : index
    %227 = vector.load %arg15[%c0_238, %c128_239] : memref<8x512xf32, #tpu.memory_space<vmem>>, vector<8x288xf32>
    tpu.vector_store %arg15[%c0_238, %c128_239], %226 {strides = array<i32>} : memref<8x512xf32, #tpu.memory_space<vmem>>, vector<8x288xf32>,
    %c0_240 = arith.constant 0 : index
    %c109_241 = arith.constant 109 : index
    %228 = vector.load %arg15[%c0_240, %c109_241] : memref<8x512xf32, #tpu.memory_space<vmem>>, vector<8x288xf32>
    %c0_242 = arith.constant 0 : index
    %c0_243 = arith.constant 0 : index
    %c0_244 = arith.constant 0 : index
    %229 = vector.load %arg12[%c0_242, %c0_243, %c0_244] : memref<9x8x8xf32, #tpu.memory_space<vmem>>, vector<1x8x8xf32>
    %230 = vector.shape_cast %229 : vector<1x8x8xf32> to vector<8x8xf32>
    %cst_245 = arith.constant dense<0.000000e+00> : vector<8x288xf32>
    %231 = tpu.matmul %230, %228, %cst_245 {dimension_numbers = #tpu.dot_dimension_numbers<[1], [0], [0], [1], [0, 0, 1, 1], [], []>} : vector<8x8xf32>, vector<8x288xf32>, vector<8x288xf32> -> vector<8x288xf32>
    %c0_246 = arith.constant 0 : index
    %c110_247 = arith.constant 110 : index
    %232 = vector.load %arg15[%c0_246, %c110_247] : memref<8x512xf32, #tpu.memory_space<vmem>>, vector<8x288xf32>
    %c1_248 = arith.constant 1 : index
    %c0_249 = arith.constant 0 : index
    %c0_250 = arith.constant 0 : index
    %233 = vector.load %arg12[%c1_248, %c0_249, %c0_250] : memref<9x8x8xf32, #tpu.memory_space<vmem>>, vector<1x8x8xf32>
    %234 = vector.shape_cast %233 : vector<1x8x8xf32> to vector<8x8xf32>
    %cst_251 = arith.constant dense<0.000000e+00> : vector<8x288xf32>
    %235 = tpu.matmul %234, %232, %cst_251 {dimension_numbers = #tpu.dot_dimension_numbers<[1], [0], [0], [1], [0, 0, 1, 1], [], []>} : vector<8x8xf32>, vector<8x288xf32>, vector<8x288xf32> -> vector<8x288xf32>
    %c0_252 = arith.constant 0 : index
    %c111_253 = arith.constant 111 : index
    %236 = vector.load %arg15[%c0_252, %c111_253] : memref<8x512xf32, #tpu.memory_space<vmem>>, vector<8x288xf32>
    %c2_254 = arith.constant 2 : index
    %c0_255 = arith.constant 0 : index
    %c0_256 = arith.constant 0 : index
    %237 = vector.load %arg12[%c2_254, %c0_255, %c0_256] : memref<9x8x8xf32, #tpu.memory_space<vmem>>, vector<1x8x8xf32>
    %238 = vector.shape_cast %237 : vector<1x8x8xf32> to vector<8x8xf32>
    %cst_257 = arith.constant dense<0.000000e+00> : vector<8x288xf32>
    %239 = tpu.matmul %238, %236, %cst_257 {dimension_numbers = #tpu.dot_dimension_numbers<[1], [0], [0], [1], [0, 0, 1, 1], [], []>} : vector<8x8xf32>, vector<8x288xf32>, vector<8x288xf32> -> vector<8x288xf32>
    %c0_258 = arith.constant 0 : index
    %c127_259 = arith.constant 127 : index
    %240 = vector.load %arg15[%c0_258, %c127_259] : memref<8x512xf32, #tpu.memory_space<vmem>>, vector<8x288xf32>
    %c3_260 = arith.constant 3 : index
    %c0_261 = arith.constant 0 : index
    %c0_262 = arith.constant 0 : index
    %241 = vector.load %arg12[%c3_260, %c0_261, %c0_262] : memref<9x8x8xf32, #tpu.memory_space<vmem>>, vector<1x8x8xf32>
    %242 = vector.shape_cast %241 : vector<1x8x8xf32> to vector<8x8xf32>
    %cst_263 = arith.constant dense<0.000000e+00> : vector<8x288xf32>
    %243 = tpu.matmul %242, %240, %cst_263 {dimension_numbers = #tpu.dot_dimension_numbers<[1], [0], [0], [1], [0, 0, 1, 1], [], []>} : vector<8x8xf32>, vector<8x288xf32>, vector<8x288xf32> -> vector<8x288xf32>
    %c0_264 = arith.constant 0 : index
    %c128_265 = arith.constant 128 : index
    %244 = vector.load %arg15[%c0_264, %c128_265] : memref<8x512xf32, #tpu.memory_space<vmem>>, vector<8x288xf32>
    %c4_266 = arith.constant 4 : index
    %c0_267 = arith.constant 0 : index
    %c0_268 = arith.constant 0 : index
    %245 = vector.load %arg12[%c4_266, %c0_267, %c0_268] : memref<9x8x8xf32, #tpu.memory_space<vmem>>, vector<1x8x8xf32>
    %246 = vector.shape_cast %245 : vector<1x8x8xf32> to vector<8x8xf32>
    %cst_269 = arith.constant dense<0.000000e+00> : vector<8x288xf32>
    %247 = tpu.matmul %246, %244, %cst_269 {dimension_numbers = #tpu.dot_dimension_numbers<[1], [0], [0], [1], [0, 0, 1, 1], [], []>} : vector<8x8xf32>, vector<8x288xf32>, vector<8x288xf32> -> vector<8x288xf32>
    %c0_270 = arith.constant 0 : index
    %c129_271 = arith.constant 129 : index
    %248 = vector.load %arg15[%c0_270, %c129_271] : memref<8x512xf32, #tpu.memory_space<vmem>>, vector<8x288xf32>
    %c5_272 = arith.constant 5 : index
    %c0_273 = arith.constant 0 : index
    %c0_274 = arith.constant 0 : index
    %249 = vector.load %arg12[%c5_272, %c0_273, %c0_274] : memref<9x8x8xf32, #tpu.memory_space<vmem>>, vector<1x8x8xf32>
    %250 = vector.shape_cast %249 : vector<1x8x8xf32> to vector<8x8xf32>
    %cst_275 = arith.constant dense<0.000000e+00> : vector<8x288xf32>
    %251 = tpu.matmul %250, %248, %cst_275 {dimension_numbers = #tpu.dot_dimension_numbers<[1], [0], [0], [1], [0, 0, 1, 1], [], []>} : vector<8x8xf32>, vector<8x288xf32>, vector<8x288xf32> -> vector<8x288xf32>
    %c0_276 = arith.constant 0 : index
    %c145_277 = arith.constant 145 : index
    %252 = vector.load %arg15[%c0_276, %c145_277] : memref<8x512xf32, #tpu.memory_space<vmem>>, vector<8x288xf32>
    %c6_278 = arith.constant 6 : index
    %c0_279 = arith.constant 0 : index
    %c0_280 = arith.constant 0 : index
    %253 = vector.load %arg12[%c6_278, %c0_279, %c0_280] : memref<9x8x8xf32, #tpu.memory_space<vmem>>, vector<1x8x8xf32>
    %254 = vector.shape_cast %253 : vector<1x8x8xf32> to vector<8x8xf32>
    %cst_281 = arith.constant dense<0.000000e+00> : vector<8x288xf32>
    %255 = tpu.matmul %254, %252, %cst_281 {dimension_numbers = #tpu.dot_dimension_numbers<[1], [0], [0], [1], [0, 0, 1, 1], [], []>} : vector<8x8xf32>, vector<8x288xf32>, vector<8x288xf32> -> vector<8x288xf32>
    %c0_282 = arith.constant 0 : index
    %c146_283 = arith.constant 146 : index
    %256 = vector.load %arg15[%c0_282, %c146_283] : memref<8x512xf32, #tpu.memory_space<vmem>>, vector<8x288xf32>
    %c7_284 = arith.constant 7 : index
    %c0_285 = arith.constant 0 : index
    %c0_286 = arith.constant 0 : index
    %257 = vector.load %arg12[%c7_284, %c0_285, %c0_286] : memref<9x8x8xf32, #tpu.memory_space<vmem>>, vector<1x8x8xf32>
    %258 = vector.shape_cast %257 : vector<1x8x8xf32> to vector<8x8xf32>
    %cst_287 = arith.constant dense<0.000000e+00> : vector<8x288xf32>
    %259 = tpu.matmul %258, %256, %cst_287 {dimension_numbers = #tpu.dot_dimension_numbers<[1], [0], [0], [1], [0, 0, 1, 1], [], []>} : vector<8x8xf32>, vector<8x288xf32>, vector<8x288xf32> -> vector<8x288xf32>
    %c0_288 = arith.constant 0 : index
    %c147_289 = arith.constant 147 : index
    %260 = vector.load %arg15[%c0_288, %c147_289] : memref<8x512xf32, #tpu.memory_space<vmem>>, vector<8x288xf32>
    %c8_290 = arith.constant 8 : index
    %c0_291 = arith.constant 0 : index
    %c0_292 = arith.constant 0 : index
    %261 = vector.load %arg12[%c8_290, %c0_291, %c0_292] : memref<9x8x8xf32, #tpu.memory_space<vmem>>, vector<1x8x8xf32>
    %262 = vector.shape_cast %261 : vector<1x8x8xf32> to vector<8x8xf32>
    %cst_293 = arith.constant dense<0.000000e+00> : vector<8x288xf32>
    %263 = tpu.matmul %262, %260, %cst_293 {dimension_numbers = #tpu.dot_dimension_numbers<[1], [0], [0], [1], [0, 0, 1, 1], [], []>} : vector<8x8xf32>, vector<8x288xf32>, vector<8x288xf32> -> vector<8x288xf32>
    %264 = arith.addf %231, %235 : vector<8x288xf32>
    %265 = arith.addf %239, %243 : vector<8x288xf32>
    %266 = arith.addf %247, %251 : vector<8x288xf32>
    %267 = arith.addf %255, %259 : vector<8x288xf32>
    %268 = arith.addf %264, %265 : vector<8x288xf32>
    %269 = arith.addf %266, %267 : vector<8x288xf32>
    %270 = arith.addf %268, %269 : vector<8x288xf32>
    %271 = arith.addf %270, %263 : vector<8x288xf32>
    %c0_294 = arith.constant 0 : index
    %c0_295 = arith.constant 0 : index
    %272 = vector.load %arg13[%c0_294, %c0_295] : memref<8x1xf32, #tpu.memory_space<vmem>>, vector<8x1xf32>
    %273 = vector.broadcast %272 : vector<8x1xf32> to vector<8x288xf32>
    %274 = arith.addf %271, %273 : vector<8x288xf32>
    %275 = arith.addf %170, %274 : vector<8x288xf32>
    %c0_296 = arith.constant 0 : index
    %c0_297 = arith.constant 0 : index
    %c0_298 = arith.constant 0 : index
    %276 = vector.load %arg14[%c0_296, %c0_297, %c0_298] : memref<1x8x384xf32, #tpu.memory_space<vmem>>, vector<1x8x288xf32>
    %277 = vector.shape_cast %276 : vector<1x8x288xf32> to vector<8x288xf32>
    %278 = vector.shape_cast %275 : vector<8x288xf32> to vector<1x8x288xf32>
    tpu.vector_store %arg14[%c0_296, %c0_297, %c0_298], %278 {strides = array<i32>} : memref<1x8x384xf32, #tpu.memory_space<vmem>>, vector<1x8x288xf32>,
    %cst_299 = arith.constant 0.000000e+00 : f32
    %279 = vector.broadcast %cst_299 : f32 to vector<8x96xf32>
    %c0_300 = arith.constant 0 : index
    %c0_301 = arith.constant 0 : index
    %c288 = arith.constant 288 : index
    %280 = vector.load %arg14[%c0_300, %c0_301, %c288] : memref<1x8x384xf32, #tpu.memory_space<vmem>>, vector<1x8x96xf32>
    %281 = vector.shape_cast %280 : vector<1x8x96xf32> to vector<8x96xf32>
    %282 = vector.shape_cast %279 : vector<8x96xf32> to vector<1x8x96xf32>
    tpu.vector_store %arg14[%c0_300, %c0_301, %c288], %282 {strides = array<i32>} : memref<1x8x384xf32, #tpu.memory_space<vmem>>, vector<1x8x96xf32>,
    return
  }
  func.func @transform_0(%arg0: i32) -> (i32, i32, i32) {
    %c0_i32 = arith.constant 0 : i32
    %c0_i32_0 = arith.constant 0 : i32
    %c0_i32_1 = arith.constant 0 : i32
    return %arg0, %c0_i32, %c0_i32_0 : i32, i32, i32
  }
  func.func @transform_1(%arg0: i32) -> (i32, i32, i32) {
    %c0_i32 = arith.constant 0 : i32
    %c0_i32_0 = arith.constant 0 : i32
    %c0_i32_1 = arith.constant 0 : i32
    return %arg0, %c0_i32, %c0_i32_0 : i32, i32, i32
  }
  func.func @transform_2(%arg0: i32) -> (i32, i32) {
    %c0_i32 = arith.constant 0 : i32
    %c0_i32_0 = arith.constant 0 : i32
    %c0_i32_1 = arith.constant 0 : i32
    return %c0_i32, %c0_i32_0 : i32, i32
  }
  func.func @transform_3(%arg0: i32) -> (i32, i32, i32) {
    %c0_i32 = arith.constant 0 : i32
    %c0_i32_0 = arith.constant 0 : i32
    %c0_i32_1 = arith.constant 0 : i32
    %c0_i32_2 = arith.constant 0 : i32
    return %c0_i32, %c0_i32_0, %c0_i32_1 : i32, i32, i32
  }
  func.func @transform_4(%arg0: i32) -> (i32, i32) {
    %c0_i32 = arith.constant 0 : i32
    %c0_i32_0 = arith.constant 0 : i32
    %c0_i32_1 = arith.constant 0 : i32
    return %c0_i32, %c0_i32_0 : i32, i32
  }
  func.func @transform_5(%arg0: i32) -> (i32, i32, i32) {
    %c0_i32 = arith.constant 0 : i32
    %c0_i32_0 = arith.constant 0 : i32
    %c0_i32_1 = arith.constant 0 : i32
    %c0_i32_2 = arith.constant 0 : i32
    return %c0_i32, %c0_i32_0, %c0_i32_1 : i32, i32, i32
  }
  func.func @transform_6(%arg0: i32) -> (i32, i32) {
    %c0_i32 = arith.constant 0 : i32
    %c0_i32_0 = arith.constant 0 : i32
    %c0_i32_1 = arith.constant 0 : i32
    return %c0_i32, %c0_i32_0 : i32, i32
  }
  func.func @transform_7(%arg0: i32) -> (i32, i32, i32) {
    %c0_i32 = arith.constant 0 : i32
    %c0_i32_0 = arith.constant 0 : i32
    %c0_i32_1 = arith.constant 0 : i32
    %c0_i32_2 = arith.constant 0 : i32
    return %c0_i32, %c0_i32_0, %c0_i32_1 : i32, i32, i32
  }
  func.func @transform_8(%arg0: i32) -> (i32, i32) {
    %c0_i32 = arith.constant 0 : i32
    %c0_i32_0 = arith.constant 0 : i32
    %c0_i32_1 = arith.constant 0 : i32
    return %c0_i32, %c0_i32_0 : i32, i32
  }
  func.func @transform_9(%arg0: i32) -> (i32, i32, i32) {
    %c0_i32 = arith.constant 0 : i32
    %c0_i32_0 = arith.constant 0 : i32
    %c0_i32_1 = arith.constant 0 : i32
    %c0_i32_2 = arith.constant 0 : i32
    return %c0_i32, %c0_i32_0, %c0_i32_1 : i32, i32, i32
  }
  func.func @transform_10(%arg0: i32) -> (i32, i32) {
    %c0_i32 = arith.constant 0 : i32
    %c0_i32_0 = arith.constant 0 : i32
    %c0_i32_1 = arith.constant 0 : i32
    return %c0_i32, %c0_i32_0 : i32, i32
  }
  func.func @transform_11(%arg0: i32) -> (i32, i32, i32) {
    %c0_i32 = arith.constant 0 : i32
    %c0_i32_0 = arith.constant 0 : i32
    %c0_i32_1 = arith.constant 0 : i32
    %c0_i32_2 = arith.constant 0 : i32
    return %c0_i32, %c0_i32_0, %c0_i32_1 : i32, i32, i32
  }
  func.func @transform_12(%arg0: i32) -> (i32, i32) {
    %c0_i32 = arith.constant 0 : i32
    %c0_i32_0 = arith.constant 0 : i32
    %c0_i32_1 = arith.constant 0 : i32
    return %c0_i32, %c0_i32_0 : i32, i32
  }
  func.func @transform_13(%arg0: i32) -> (i32, i32, i32) {
    %c0_i32 = arith.constant 0 : i32
    %c0_i32_0 = arith.constant 0 : i32
    %c0_i32_1 = arith.constant 0 : i32
    return %arg0, %c0_i32, %c0_i32_0 : i32, i32, i32
  }
}

</mosaic_0001>

<bundles_post_ra>
// kernel: refine_forward.1
= control target key start
LH: loop header
LB: loop body
LE: loop exit
PB: predicated region body
PF: predicated region fallthrough
CT: control target
= control target key end

     0   :  { %s8553_s25 = smov 0   ;;  %s9498_s0 = inlined_call_operand.vmem [shape: f32[2,4,512], index: 0, kind: input, shape index: {}]   ;;  %s9499_s1 = inlined_call_operand.vmem [shape: f32[2,8,384], index: 1, kind: input, shape index: {}]   ;;  %s9500_s2 = inlined_call_operand.vmem [shape: f32[1,288], index: 2, kind: input, shape index: {}]   ;;  %s9501_s3 = inlined_call_operand.vmem [shape: f32[9,8,4], index: 3, kind: input, shape index: {}]   ;;  %s9502_s4 = inlined_call_operand.vmem [shape: f32[8,1], index: 4, kind: input, shape index: {}]   ;;  %s9503_s5 = inlined_call_operand.vmem [shape: f32[9,8,8], index: 5, kind: input, shape index: {}]   ;;  %s9504_s6 = inlined_call_operand.vmem [shape: f32[8,1], index: 6, kind: input, shape index: {}]   ;;  %s9505_s7 = inlined_call_operand.vmem [shape: f32[9,8,8], index: 7, kind: input, shape index: {}]   ;;  %s9506_s8 = inlined_call_operand.vmem [shape: f32[8,1], index: 8, kind: input, shape index: {}]   ;;  %s9507_s9 = inlined_call_operand.vmem [shape: f32[9,8,8], index: 9, kind: input, shape index: {}]   ;;  %s9508_s10 = inlined_call_operand.vmem [shape: f32[8,1], index: 10, kind: input, shape index: {}]   ;;  %s9509_s11 = inlined_call_operand.vmem [shape: f32[9,8,8], index: 11, kind: input, shape index: {}]   ;;  %s9510_s12 = inlined_call_operand.vmem [shape: f32[8,1], index: 12, kind: input, shape index: {}]   ;;  %s9511_s13 = inlined_call_operand.vmem [shape: f32[2,8,384], index: 13, kind: output, shape index: {}]  }
   0x1 LB: > { %s7873_s26 = sadd.s32 4294967295, %s8470_s25   ;;  %p7877_p0 = scmp.ge.s32.totalorder %s8470_s25, 1  ;;  %s8470_s25 = sphi %s8553_s25, %s23_s25  }
   0x2   : > { %p397_p1 = scmp.lt.s32.totalorder %s8470_s25, 3 }
   0x4   : > { %p398_p2 = pnand %p7877_p0, %p397_p1 }
   0x5   : > { %p446_p3 = scmp.lt.s32.totalorder (!%p398_p2), %s7873_s26, 1  ;;  %v8472_v0 = vmov (!%p398_p2), 0.0   ;;  %s8473_s14 = smov (!%p398_p2), 18   ;;  %vm8478_vm0 = vmmov (!%p398_p2), 0   ;;  %v1959_v10 = vld [vmem:[%s9502_s4] sm:$0xff] (!%p398_p2)  ;;  %v8482_v11 = vmov (!%p398_p2), 0  }
   0x6   : > { %401 = sbr.rel (%p398_p2) target bundleno = 2043 (0x7fb), region = 72  ;;  %563 = vmatprep.mubr.f32.mxu0 (!%p398_p2), %v8472_v0  ;;  %461 = vst [vmem:[#allocation2] sm:$0xff] (!%p398_p2), %v8472_v0  ;;  %8132 = vmatprep.subr.mxu1 (!%p398_p2), %v8472_v0  ;;  %s8474_s15 = smov (!%p398_p2), 1   ;;  %vm484_vm1 = vcmask (!%p398_p2), 146432   ;;  %vm492_vm2 = vcmask (!%p398_p2), 1043456   ;;  %vm658_vm3 = vcmask (!%p398_p2), 7168  }
   0x7   : > { %s8475_s16 = smov (!%p398_p2), 127   ;;  %s8476_s17 = smov (!%p398_p2), 110   ;;  %8134 = vmatprep.mubr.msk.f32.mxu1 (!%p398_p2), %vm8478_vm0, %v8472_v0  ;;  %8457 = vset.pattern.permute.xlu0 (!%p398_p2), %v8482_v11  ;;  %v7882_v17 = vld [vmem:[%s9501_s3 + $0x8] sm:$0xff] (!%p398_p2)  ;;  %vm488_vm4 = vcmask (!%p398_p2), 31744   ;;  %vm827_vm5 = vcmask (!%p398_p2), 1039360   ;;  %v7889_v25 = vld [vmem:[%s9501_s3 + $0x18] sm:$0xff] (!%p398_p2) }
   0x8   : > { %s8477_s18 = smov (!%p398_p2), 109   ;;  %s8479_s19 = smov (!%p398_p2), 19   ;;  %8458 = vset.pattern.permute.xlu1 (!%p398_p2), %v8482_v11  ;;  %vm995_vm6 = vcmask (!%p398_p2), 900096   ;;  %v7896_v32 = vld [vmem:[%s9501_s3 + $0x28] sm:$0xff] (!%p398_p2)  ;;  %vm1161_vm7 = vcmask (!%p398_p2), 891904   ;;  %v7903_v40 = vld [vmem:[%s9501_s3 + $0x38] sm:$0xff] (!%p398_p2) }
   0x9   : > { %s8480_s20 = smov (!%p398_p2), 17   ;;  %s8481_s21 = smov (!%p398_p2), 111   ;;  %vm1322_vm8 = vcmask (!%p398_p2), 154624   ;;  %v7909_v48 = vld [vmem:[%s9501_s3 + $0x40] sm:$0xff] (!%p398_p2)  ;;  %vm1484_vm9 = vcmask (!%p398_p2), 138240   ;;  %v7888_v59 = vld [vmem:[%s9501_s3 + $0x10] sm:$0xff] (!%p398_p2) }
   0xa   : > { %v469_v55 = vld [vmem:[%s9501_s3] sm:$0xff] (!%p398_p2)  ;;  %vm1794_vm10 = vcmask (!%p398_p2), 908288   ;;  %vm463_vm11 = vcmask (!%p398_p2), 1047808   ;;  %vm1992_vm12 = vcmask (!%p398_p2), 261120   ;;  %vm2019_vm13 = vcmask (!%p398_p2), 64512  }
   0xb   : > { %465 = vst.msk [vmem:[#allocation3 + $0x18] sm:$0xff] (!%p398_p2), %vm463_vm11, %v8472_v0  ;;  %464 = vst.msk [vmem:[#allocation2 + $0x18] sm:$0xff] (!%p398_p2), %vm463_vm11, %v8472_v0 }
   0xd   : > { %s9513_s26 = smov (!%p446_p3, %s7873_s26), 1 }
   0xe   : > { %s8041_s27 = sshll.u32 %s9513_s26, 4 }
   0xf   : > { %s450_s30 = scalar_lea.vmem %s9498_s0, %s8041_s27 }
  0x10   : > { %v467_v1 = vld [vmem:[%s450_s30] sm:$0xff]  ;;  %v468_v3 = vld [vmem:[%s450_s30 + $0x8] sm:$0xff] }
  0x11   : > { %476 = vrot.lane.b32.xlu1 %v467_v1, %s8473_s14  ;;  %v474_v2 = vcombine.high %v467_v1, %v467_v1  ;;  %v8574_v4 = vld [vmem:[%s450_s30 + $0x4] sm:$0xff]  ;;  %v8577_v5 = vld [vmem:[%s450_s30 + $0xc] sm:$0xf]  ;;  %v649_v9 = vcombine.high %v468_v3, %v468_v3 }
  0x12   : > { %v8582_v6 = vcombine.high %v8574_v4, %v8574_v4  ;;  %v981_v7 = vld [vmem:[%s450_s30 + $0xc] sm:$0xf] }
  0x13   : > { %478 = vrot.lane.b32.xlu0 %v474_v2, %s8473_s14  ;;  %v1149_v8 = vld [vmem:[%s450_s30 + $0xc] sm:$0xf]  ;;  %s8437_s30 = smul.u32 24, %s9513_s26 }
  0x15   : > { %652 = vrot.lane.b32.xlu1 %v474_v2, %s8474_s15  ;;  %s455_s24 = scalar_lea.vmem %s9499_s1, %s8437_s30  ;;  %s460_s29 = scalar_lea.vmem %s9511_s13, %s8437_s30 }
  0x17   : > { %480 = vrot.lane.b32.xlu0 %v468_v3, %s8473_s14 }
  0x19   : > { %650 = vrot.lane.b32.xlu1 %v467_v1, %s8474_s15 }
  0x1b   : > { %654 = vrot.lane.b32.xlu0 %v468_v3, %s8474_s15 }
  0x1d   : > { %825 = vrot.lane.b32.xlu1 %v8577_v5, %s8475_s16 }
  0x1f   : > { %823 = vrot.lane.b32.xlu0 %v8582_v6, %s8475_s16 }
  0x21   : > { %991 = vrot.lane.b32.xlu1 %v8582_v6, %s8476_s17 }
  0x23   : > { %821 = vrot.lane.b32.xlu0 %v8574_v4, %s8475_s16 }
  0x25   : > { %989 = vrot.lane.b32.xlu1 %v8574_v4, %s8476_s17 }
  0x27   : > { %993 = vrot.lane.b32.xlu0 %v981_v7, %s8476_s17 }
  0x29   : > { %1159 = vrot.lane.b32.xlu1 %v1149_v8, %s8477_s18 }
  0x2b   : > { %1157 = vrot.lane.b32.xlu0 %v8582_v6, %s8477_s18 }
  0x2d   : > { %1316 = vrot.lane.b32.xlu1 %v474_v2, %s8479_s19 }
  0x2f   : > { %1155 = vrot.lane.b32.xlu0 %v8574_v4, %s8477_s18 }
  0x31   : > { %1314 = vrot.lane.b32.xlu1 %v467_v1, %s8479_s19 }
  0x33   : > { %1318 = vrot.lane.b32.xlu0 %v468_v3, %s8479_s19 }
  0x35   : > { %656 = vrot.lane.b32.xlu1 %v649_v9, %s8474_s15 }
  0x37   : > { %482 = vrot.lane.b32.xlu0 %v649_v9, %s8473_s14 }
  0x39   : > { %1480 = vrot.lane.b32.xlu1 %v468_v3, %s8480_s20  ;;  %v7895_v3 = vld [vmem:[%s9501_s3 + $0x20] sm:$0xff] }
  0x3b   : > { %1478 = vrot.lane.b32.xlu0 %v474_v2, %s8480_s20 }
  0x3d   : > { %1320 = vrot.lane.b32.xlu1 %v649_v9, %s8479_s19 }
  0x3f   : > { %1476 = vrot.lane.b32.xlu0 %v467_v1, %s8480_s20 }
  0x41   : > { %1792 = vrot.lane.b32.xlu1 %v981_v7, %s8481_s21 }
  0x43   : > { %1790 = vrot.lane.b32.xlu0 %v8582_v6, %s8481_s21 }
  0x45   : > { %1482 = vrot.lane.b32.xlu1 %v649_v9, %s8480_s20 }
  0x47   : > { %1788 = vrot.lane.b32.xlu0 %v8574_v4, %s8481_s21 }
  0x4b   : > { %1962 = vperm.xlu0 %8457, %v1959_v10  }
  0x4f   : > { %2005 = vrot.lane.b32.xlu0 %v8472_v0, %s8473_s14 }
  0x83   : > { %v477_v12 = vpop.permute.xlu1 %476 }
  0x85   : > { %v479_v13 = vpop.permute.xlu0 %478 }
  0x86   : > { %v485_v19 = vsel %vm484_vm1, %v477_v12, %v479_v13 }
  0x87   : > { %v653_v14 = vpop.permute.xlu1 %652 }
  0x89   : > { %v481_v15 = vpop.permute.xlu0 %480 }
  0x8a   : > { %v486_v16 = vsel %vm484_vm1, %v479_v13, %v481_v15 }
  0x8b   : > { %v651_v18 = vpop.permute.xlu1 %650  ;;  %7883 = vmatprep.subr.msk.mxu0 %vm492_vm2, %v486_v16 }
  0x8c   : > { %7884 = vmatpush1.msk.msra.mxu0 %vm492_vm2, %v485_v19  ;;  %v659_v20 = vsel %vm658_vm3, %v651_v18, %v653_v14  ;;  %v1972_v19 = vlaneseq }
  0x8d   : > { %7885 = vmatmul.mubr.msk.f32.vlgmr.msra.gmra.mrb[0].mxu0 %vm488_vm4, %v7882_v17  ;;  %v655_v21 = vpop.permute.xlu0 %654 }
  0x8e   : > { %v660_v22 = vsel %vm658_vm3, %v653_v14, %v655_v21  ;;  %735 = vmatprep.mubr.f32.mxu0 %v8472_v0 }
  0x8f   : > { %v826_v23 = vpop.permute.xlu1 %825  ;;  %7890 = vmatprep.subr.msk.mxu0 %vm492_vm2, %v660_v22 }
  0x90   : > { %7891 = vmatpush1.msk.msra.mxu0 %vm492_vm2, %v659_v20 }
  0x91   : > { %v824_v24 = vpop.permute.xlu0 %823 }
  0x92   : > { %v829_v26 = vsel %vm827_vm5, %v824_v24, %v826_v23 }
  0x93   : > { %v992_v27 = vpop.permute.xlu1 %991  ;;  %7897 = vmatprep.subr.msk.mxu0 %vm492_vm2, %v829_v26 }
  0x95   : > { %7892 = vmatmul.mubr.msk.f32.vlgmr.msra.gmra.mrb[0].mxu0 %vm488_vm4, %v7889_v25  ;;  %v822_v28 = vpop.permute.xlu0 %821 }
  0x96   : > { %v828_v29 = vsel %vm827_vm5, %v822_v28, %v824_v24  ;;  %903 = vmatprep.mubr.f32.mxu0 %v8472_v0 }
  0x97   : > { %v990_v30 = vpop.permute.xlu1 %989  ;;  %7898 = vmatpush1.msk.msra.mxu0 %vm492_vm2, %v828_v29  ;;  %v466_v29 = vld [vmem:[%s9500_s2] sm:$0x7] }
  0x98   : > { %v996_v34 = vsel %vm995_vm6, %v990_v30, %v992_v27 }
  0x99   : > { %v994_v31 = vpop.permute.xlu0 %993 }
  0x9a   : > { %v997_v33 = vsel %vm995_vm6, %v992_v27, %v994_v31 }
  0x9b   : > { %v1160_v35 = vpop.permute.xlu1 %1159  ;;  %7904 = vmatprep.subr.msk.mxu0 %vm492_vm2, %v997_v33 }
  0x9d   : > { %7899 = vmatmul.mubr.msk.f32.vlgmr.msra.gmra.mrb[0].mxu0 %vm488_vm4, %v7896_v32  ;;  %v1158_v36 = vpop.permute.xlu0 %1157 }
  0x9e   : > { %7905 = vmatpush1.msk.msra.mxu0 %vm492_vm2, %v996_v34  ;;  %1071 = vmatprep.mubr.f32.mxu0 %v8472_v0  ;;  %v1163_v37 = vsel %vm1161_vm7, %v1158_v36, %v1160_v35 }
  0x9f   : > { %v1317_v38 = vpop.permute.xlu1 %1316  ;;  %7910 = vmatprep.subr.msk.mxu0 %vm492_vm2, %v1163_v37 }
  0xa1   : > { %v1156_v39 = vpop.permute.xlu0 %1155 }
  0xa2   : > { %v1162_v41 = vsel %vm1161_vm7, %v1156_v39, %v1158_v36 }
  0xa3   : > { %v1315_v42 = vpop.permute.xlu1 %1314 }
  0xa4   : > { %v1323_v49 = vsel %vm1322_vm8, %v1315_v42, %v1317_v38 }
  0xa5   : > { %7906 = vmatmul.mubr.msk.f32.vlgmr.msra.gmra.mrb[0].mxu0 %vm488_vm4, %v7903_v40  ;;  %v1319_v43 = vpop.permute.xlu0 %1318 }
  0xa6   : > { %7911 = vmatpush1.msk.msra.mxu0 %vm492_vm2, %v1162_v41  ;;  %1237 = vmatprep.mubr.f32.mxu0 %v8472_v0  ;;  %v1324_v44 = vsel %vm1322_vm8, %v1317_v38, %v1319_v43 }
  0xa7   : > { %v657_v45 = vpop.permute.xlu1 %656  ;;  %7915 = vmatprep.subr.msk.mxu0 %vm492_vm2, %v1324_v44 }
  0xa8   : > { %v661_v50 = vsel %vm658_vm3, %v655_v21, %v657_v45 }
  0xa9   : > { %v483_v46 = vpop.permute.xlu0 %482 }
  0xaa   : > { %v487_v47 = vsel %vm484_vm1, %v481_v15, %v483_v46 }
  0xab   : > { %8133 = vmatpush3.msk.msra.mxu1 %vm492_vm2, %v487_v47  ;;  %v1481_v51 = vpop.permute.xlu1 %1480 }
  0xac   : > { %8135 = vmatmul.mubr.msk.f32.vlgmr.msra.gmra.mrb[0].mxu1 %vm488_vm4, %v7882_v17  ;;  %8137 = vmatprep.subr.mxu1 %v8472_v0 }
  0xad   : > { %8138 = vmatpush3.msk.msra.mxu1 %vm492_vm2, %v661_v50  ;;  %7912 = vmatmul.mubr.msk.f32.vlgmr.msra.gmra.mrb[0].mxu0 %vm488_vm4, %v7909_v48  ;;  %v1479_v52 = vpop.permute.xlu0 %1478 }
  0xae   : > { %7916 = vmatpush1.msk.msra.mxu0 %vm492_vm2, %v1323_v49  ;;  %8139 = vmatprep.mubr.msk.f32.mxu1 %vm8478_vm0, %v8472_v0  ;;  %v1486_v53 = vsel %vm1484_vm9, %v1479_v52, %v1481_v51 }
  0xaf   : > { %8142 = vmatprep.subr.mxu1 %v8472_v0  ;;  %1399 = vmatprep.mubr.f32.mxu0 %v8472_v0  ;;  %v1321_v56 = vpop.permute.xlu1 %1320 }
  0xb0   : > { %8140 = vmatmul.mubr.msk.f32.vlgmr.msra.gmra.mrb[2].mxu1 %vm488_vm4, %v7889_v25  ;;  %7920 = vmatprep.subr.msk.mxu0 %vm492_vm2, %v1486_v53  ;;  %v1325_v61 = vsel %vm1322_vm8, %v1319_v43, %v1321_v56 }
  0xb1   : > { %8143 = vmatpush3.msk.msra.mxu1 %vm492_vm2, %v826_v23  ;;  %8144 = vmatprep.mubr.msk.f32.mxu1 %vm8478_vm0, %v8472_v0  ;;  %v1477_v54 = vpop.permute.xlu0 %1476  ;;  %v1973_v23 = vshrl.u32 %v1972_v19, 7 }
  0xb2   : > { %8147 = vmatprep.subr.mxu1 %v8472_v0  ;;  %v1485_v57 = vsel %vm1484_vm9, %v1477_v54, %v1479_v52  ;;  %v3428_v54 = vld [vmem:[%s9504_s6] sm:$0xff] }
  0xb3   : > { %v1793_v58 = vpop.permute.xlu1 %1792  ;;  %v1974_v28 = vsub.s32 0, %v1973_v23  ;;  %v1982_v44 = vsub.s32 2, %v1973_v23 }
  0xb4   : > { %8145 = vmatmul.mubr.msk.f32.vlgmr.msra.gmra.mrb[4].mxu1 %vm488_vm4, %v7896_v32 }
  0xb5   : > { %8148 = vmatpush3.msk.msra.mxu1 %vm492_vm2, %v994_v31  ;;  %7917 = vmatmul.mubr.msk.f32.vlgmr.msra.gmra.mrb[0].mxu0 %vm488_vm4, %v469_v55  ;;  %v1791_v60 = vpop.permute.xlu0 %1790  ;;  %v1978_v31 = vsub.s32 1, %v1973_v23  ;;  %v8760_v36 = vrot.slane %v466_v29, %v1974_v28  ;;  %v8778_v49 = vrot.slane %v466_v29, %v1982_v44 }
  0xb6   : > { %8149 = vmatprep.mubr.msk.f32.mxu1 %vm8478_vm0, %v8472_v0  ;;  %8152 = vmatprep.subr.mxu1 %v8472_v0  ;;  %v1796_v63 = vsel %vm1794_vm10, %v1791_v60, %v1793_v58 }
  0xb7   : > { %7921 = vmatpush1.msk.msra.mxu0 %vm492_vm2, %v1485_v57  ;;  %1561 = vmatprep.mubr.f32.mxu0 %v8472_v0  ;;  %v1483_v62 = vpop.permute.xlu1 %1482  ;;  %v8766_v41 = vrot.slane %v466_v29, %v1978_v31 }
  0xb8   : > { %8150 = vmatmul.mubr.msk.f32.vlgmr.msra.gmra.mrb[6].mxu1 %vm488_vm4, %v7903_v40  ;;  %7925 = vmatprep.subr.msk.mxu0 %vm492_vm2, %v8582_v6  ;;  %v1487_v1 = vsel %vm1484_vm9, %v1481_v51, %v1483_v62 }
  0xb9   : > { %8153 = vmatpush3.msk.msra.mxu1 %vm492_vm2, %v1160_v35  ;;  %8154 = vmatprep.mubr.msk.f32.mxu1 %vm8478_vm0, %v8472_v0  ;;  %v1789_v2 = vpop.permute.xlu0 %1788 }
  0xba   : > { %8157 = vmatprep.subr.mxu1 %v8472_v0 }
  0xbc   : > { %8155 = vmatmul.mubr.msk.f32.vlgmr.msra.gmra.mrb[8].mxu1 %vm488_vm4, %v7909_v48 }
  0xbd   : > { %8158 = vmatpush3.msk.msra.mxu1 %vm492_vm2, %v1325_v61  ;;  %7922 = vmatmul.mubr.msk.f32.vlgmr.msra.gmra.mrb[0].mxu0 %vm488_vm4, %v7888_v59  ;;  %v7935_v61 = vld [vmem:[%s9503_s5 + $0x8] sm:$0xff] }
  0xbe   : > { %8159 = vmatprep.mubr.msk.f32.mxu1 %vm8478_vm0, %v8472_v0  ;;  %8162 = vmatprep.subr.mxu1 %v8472_v0 }
  0xbf   : > { %7926 = vmatpush1.msk.msra.mxu0 %vm492_vm2, %v8574_v4  ;;  %1711 = vmatprep.mubr.f32.mxu0 %v8472_v0  ;;  %v1795_v4 = vsel %vm1794_vm10, %v1789_v2, %v1791_v60 }
  0xc0   : > { %8160 = vmatmul.mubr.msk.f32.vlgmr.msra.gmra.mrb[10].mxu1 %vm488_vm4, %v469_v55  ;;  %7930 = vmatprep.subr.msk.mxu0 %vm492_vm2, %v1796_v63 }
  0xc1   : > { %8163 = vmatpush3.msk.msra.mxu1 %vm492_vm2, %v1487_v1  ;;  %8164 = vmatprep.mubr.msk.f32.mxu1 %vm8478_vm0, %v8472_v0 }
  0xc2   : > { %8167 = vmatprep.subr.mxu1 %v8472_v0 }
  0xc4   : > { %8165 = vmatmul.mubr.msk.f32.vlgmr.msra.gmra.mrb[12].mxu1 %vm488_vm4, %v7888_v59 }
  0xc5   : > { %7927 = vmatmul.mubr.msk.f32.vlgmr.msra.gmra.mrb[0].mxu0 %vm488_vm4, %v7895_v3  ;;  %8168 = vmatpush3.msk.msra.mxu1 %vm492_vm2, %v8577_v5  ;;  %v7902_v5 = vld [vmem:[%s9501_s3 + $0x30] sm:$0xff] }
  0xc6   : > { %8169 = vmatprep.mubr.msk.f32.mxu1 %vm8478_vm0, %v8472_v0  ;;  %7931 = vmatpush1.msk.msra.mxu0 %vm492_vm2, %v1795_v4 }
  0xc7   : > { %8172 = vmatprep.subr.mxu1 %v8472_v0  ;;  %1870 = vmatprep.mubr.f32.mxu0 %v8472_v0 }
  0xc8   : > { %8170 = vmatmul.mubr.msk.f32.vlgmr.msra.gmra.mrb[14].mxu1 %vm488_vm4, %v7895_v3 }
  0xc9   : > { %8173 = vmatpush3.msk.msra.mxu1 %vm492_vm2, %v1793_v58  ;;  %8174 = vmatprep.mubr.msk.f32.mxu1 %vm8478_vm0, %v8472_v0 }
  0xca   : > { %8177 = vmatprep.subr.mxu1 %v8472_v0  ;;  %v1963_v30 = vpop.permute.xlu0 %1962 }
  0xcc   : > { %8175 = vmatmul.mubr.msk.f32.vlgmr.msra.gmra.mrb[16].mxu1 %vm488_vm4, %v7902_v5 }
  0xcd   : > { %7932 = vmatmul.mubr.msk.f32.vlgmr.msra.gmra.mrb[0].mxu0 %vm488_vm4, %v7902_v5  ;;  %8179 = vmatprep.mubr.msk.f32.mxu1 %vm8478_vm0, %v8472_v0  ;;  %v7939_v5 = vld [vmem:[%s9503_s5 + $0x18] sm:$0xff] }
  0xce   : > { %2087 = vmatprep.mubr.f32.mxu0 %v8472_v0  ;;  %v2006_v55 = vpop.permute.xlu0 %2005 }
 0x17f   : > { %v636_v6 = vpop.f32.mrb[0].mxu1 }
 0x180   : > { %v8136_v7 = vpop.f32.mrb[1].mxu1 }
 0x183   : > { %v808_v8 = vpop.f32.mrb[2].mxu1 }
 0x184   : > { %v8141_v9 = vpop.f32.mrb[3].mxu1 }
 0x187   : > { %v976_v10 = vpop.f32.mrb[4].mxu1 }
 0x188   : > { %v8146_v11 = vpop.f32.mrb[5].mxu1 }
 0x18b   : > { %v1144_v12 = vpop.f32.mrb[6].mxu1 }
 0x18c   : > { %v8151_v13 = vpop.f32.mrb[7].mxu1 }
 0x18d   : > { %v7943_v13 = vld [vmem:[%s9503_s5 + $0x28] sm:$0xff] }
 0x18f   : > { %v1310_v14 = vpop.f32.mrb[8].mxu1 }
 0x190   : > { %v8156_v15 = vpop.f32.mrb[9].mxu1 }
 0x193   : > { %v1472_v16 = vpop.f32.mrb[10].mxu1 }
 0x194   : > { %v1473_v17 = vadd.f32 %v1472_v16, %v636_v6  ;;  %v8161_v18 = vpop.f32.mrb[11].mxu1 }
 0x197   : > { %v1634_v20 = vpop.f32.mrb[12].mxu1 }
 0x198   : > { %v1635_v21 = vadd.f32 %v1634_v20, %v808_v8  ;;  %v8166_v22 = vpop.f32.mrb[13].mxu1  ;;  %v7947_v20 = vld [vmem:[%s9503_s5 + $0x38] sm:$0xff] }
 0x19a   : > { %v1949_v24 = vadd.f32 %v1635_v21, %v1473_v17 }
 0x19b   : > { %v1784_v25 = vpop.f32.mrb[14].mxu1 }
 0x19c   : > { %v1785_v26 = vadd.f32 %v1784_v25, %v976_v10  ;;  %v8171_v27 = vpop.f32.mrb[15].mxu1 }
 0x19d   : > { %v7950_v27 = vld [vmem:[%s9503_s5 + $0x40] sm:$0xff] }
 0x19f   : > { %v1943_v32 = vpop.f32.mrb[16].mxu1 }
 0x1a0   : > { %v1944_v33 = vadd.f32 %v1943_v32, %v1144_v12  ;;  %v1872_v34 = vpop.f32.mrb[0].mxu0  ;;  %v8176_v35 = vpop.f32.mrb[17].mxu1 }
 0x1a1   : > { %v8762_v37 = vadd.f32 %v1963_v30, %v1872_v34  ;;  %v1874_v38 = vpop.f32.mrb[1].mxu0  ;;  %v1998_v35 = vld [vmem:[%s9503_s5] sm:$0xff] }
 0x1a2   : > { %v1952_v39 = vadd.f32 %v1944_v33, %v1785_v26  ;;  %v8764_v40 = vadd.f32 %v1963_v30, %v1874_v38 }
 0x1a3   : > { %v1968_v42 = vmax.f32 %v8762_v37, 0.0 }
 0x1a4   : > { %v1955_v43 = vadd.f32 %v1952_v39, %v1949_v24  ;;  %v1969_v45 = vmax.f32 %v8764_v40, 0.0 }
 0x1a5   : > { %v8771_v46 = vmul.f32 %v8760_v36, %v1968_v42 }
 0x1a6   : > { %v1958_v47 = vadd.f32 %v1955_v43, %v1310_v14  ;;  %v8774_v48 = vmul.f32 %v8766_v41, %v1969_v45  ;;  %v7938_v43 = vld [vmem:[%s9503_s5 + $0x10] sm:$0xff] }
 0x1a7   : > { %2007 = vrot.lane.b32.xlu1 %v8771_v46, %s8473_s14 }
 0x1a8   : > { %v8780_v50 = vadd.f32 %v1963_v30, %v1958_v47  ;;  %2172 = vrot.lane.b32.xlu0 %v8774_v48, %s8474_s15 }
 0x1aa   : > { %v1970_v51 = vmax.f32 %v8780_v50, 0.0 }
 0x1ab   : > { %2009 = vrot.lane.b32.xlu1 %v8774_v48, %s8473_s14 }
 0x1ac   : > { %v1989_v52 = vmul.f32 %v8778_v49, %v1970_v51  ;;  %2332 = vrot.lane.b32.xlu0 %v8774_v48, %s8475_s16 }
 0x1ae   : > { %1993 = vst.msk [vmem:[#allocation3 + $0x18] sm:$0xff] %vm1992_vm12, %v1989_v52 }
 0x1af   : > { %2170 = vrot.lane.b32.xlu1 %v8771_v46, %s8474_s15 }
 0x1b0   : > { %2330 = vrot.lane.b32.xlu0 %v8771_v46, %s8475_s16 }
 0x1b3   : > { %2168 = vrot.lane.b32.xlu1 %v8472_v0, %s8474_s15 }
 0x1b5   : > { %v8797_v53 = vld [vmem:[#allocation3 + $0x18] sm:$0xff] }
 0x1b6   : > { %2493 = vrot.lane.b32.xlu0 %v8797_v53, %s8476_s17 }
 0x1b7   : > { %2334 = vrot.lane.b32.xlu1 %v8797_v53, %s8475_s16 }
 0x1ba   : > { %2648 = vrot.lane.b32.xlu0 %v8774_v48, %s8477_s18 }
 0x1bb   : > { %2491 = vrot.lane.b32.xlu1 %v8774_v48, %s8476_s17 }
 0x1be   : > { %2646 = vrot.lane.b32.xlu0 %v8771_v46, %s8477_s18 }
 0x1bf   : > { %2489 = vrot.lane.b32.xlu1 %v8771_v46, %s8476_s17 }
 0x1c2   : > { %2805 = vrot.lane.b32.xlu0 %v8774_v48, %s8479_s19 }
 0x1c3   : > { %2650 = vrot.lane.b32.xlu1 %v8797_v53, %s8477_s18 }
 0x1c6   : > { %2011 = vrot.lane.b32.xlu0 %v8797_v53, %s8473_s14 }
 0x1c7   : > { %2803 = vrot.lane.b32.xlu1 %v8771_v46, %s8479_s19 }
 0x1ca   : > { %2961 = vrot.lane.b32.xlu0 %v8771_v46, %s8480_s20 }
 0x1cb   : > { %2801 = vrot.lane.b32.xlu1 %v8472_v0, %s8479_s19 }
 0x1ce   : > { %2959 = vrot.lane.b32.xlu0 %v8472_v0, %s8480_s20 }
 0x1cf   : > { %2174 = vrot.lane.b32.xlu1 %v8797_v53, %s8474_s15 }
 0x1d2   : > { %3263 = vrot.lane.b32.xlu0 %v8774_v48, %s8481_s21 }
 0x1d3   : > { %2963 = vrot.lane.b32.xlu1 %v8774_v48, %s8480_s20 }
 0x1d6   : > { %3261 = vrot.lane.b32.xlu0 %v8771_v46, %s8481_s21 }
 0x1d7   : > { %2807 = vrot.lane.b32.xlu1 %v8797_v53, %s8479_s19 }
 0x1da   : > { %3431 = vperm.xlu0 %8457, %v3428_v54  }
 0x1db   : > { %3265 = vrot.lane.b32.xlu1 %v8797_v53, %s8481_s21 }
 0x1df   : > { %2965 = vrot.lane.b32.xlu1 %v8797_v53, %s8480_s20 }
 0x219   : > { %v2008_v56 = vpop.permute.xlu1 %2007 }
 0x21a   : > { %v8842_v57 = vpop.permute.xlu0 %2172  ;;  %v2013_v62 = vsel %vm484_vm1, %v2006_v55, %v2008_v56 }
 0x21d   : > { %v2010_v58 = vpop.permute.xlu1 %2009 }
 0x21e   : > { %v2333_v59 = vpop.permute.xlu0 %2332  ;;  %v2014_v60 = vsel %vm484_vm1, %v2008_v56, %v2010_v58 }
 0x21f   : > { %2023 = vmatprep.subr.mxu0 %v2014_v60 }
 0x220   : > { %2024 = vmatpush1.msra.mxu0 %v2013_v62 }
 0x221   : > { %v2171_v63 = vpop.permute.xlu1 %2170  ;;  %7936 = vmatmul.mubr.msk.f32.vlgmr.msra.gmra.mrb[2].mxu0 %vm2019_vm13, %v7935_v61 }
 0x222   : > { %v2177_v1 = vsel %vm658_vm3, %v2171_v63, %v8842_v57  ;;  %2249 = vmatprep.mubr.f32.mxu0 %v8472_v0  ;;  %v2331_v2 = vpop.permute.xlu0 %2330 }
 0x223   : > { %2185 = vmatprep.subr.mxu0 %v2177_v1  ;;  %v2336_v9 = vsel %vm827_vm5, %v2331_v2, %v2333_v59 }
 0x225   : > { %v2169_v3 = vpop.permute.xlu1 %2168 }
 0x226   : > { %v2176_v4 = vsel %vm658_vm3, %v2169_v3, %v2171_v63 }
 0x227   : > { %2186 = vmatpush1.msra.mxu0 %v2176_v4 }
 0x228   : > { %v2494_v6 = vpop.permute.xlu0 %2493 }
 0x229   : > { %v2335_v7 = vpop.permute.xlu1 %2334  ;;  %7940 = vmatmul.mubr.msk.f32.vlgmr.msra.gmra.mrb[2].mxu0 %vm2019_vm13, %v7939_v5 }
 0x22a   : > { %v2337_v8 = vsel %vm827_vm5, %v2333_v59, %v2335_v7  ;;  %2408 = vmatprep.mubr.f32.mxu0 %v8472_v0 }
 0x22b   : > { %2344 = vmatprep.subr.mxu0 %v2337_v8 }
 0x22c   : > { %v2649_v10 = vpop.permute.xlu0 %2648  ;;  %2345 = vmatpush1.msra.mxu0 %v2336_v9 }
 0x22d   : > { %v2492_v11 = vpop.permute.xlu1 %2491 }
 0x22e   : > { %v2496_v12 = vsel %vm995_vm6, %v2492_v11, %v2494_v6 }
 0x22f   : > { %2503 = vmatprep.subr.mxu0 %v2496_v12 }
 0x230   : > { %v2647_v14 = vpop.permute.xlu0 %2646 }
 0x231   : > { %v2490_v15 = vpop.permute.xlu1 %2489  ;;  %7944 = vmatmul.mubr.msk.f32.vlgmr.msra.gmra.mrb[2].mxu0 %vm2019_vm13, %v7943_v13  ;;  %v2652_v22 = vsel %vm1161_vm7, %v2647_v14, %v2649_v10 }
 0x232   : > { %v2495_v16 = vsel %vm995_vm6, %v2490_v15, %v2492_v11  ;;  %2567 = vmatprep.mubr.f32.mxu0 %v8472_v0 }
 0x233   : > { %2504 = vmatpush1.msra.mxu0 %v2495_v16 }
 0x234   : > { %v2806_v17 = vpop.permute.xlu0 %2805 }
 0x235   : > { %v2651_v18 = vpop.permute.xlu1 %2650 }
 0x236   : > { %v2653_v19 = vsel %vm1161_vm7, %v2649_v10, %v2651_v18 }
 0x237   : > { %2660 = vmatprep.subr.mxu0 %v2653_v19 }
 0x238   : > { %v2012_v21 = vpop.permute.xlu0 %2011 }
 0x239   : > { %v2015_v23 = vsel %vm484_vm1, %v2010_v58, %v2012_v21  ;;  %v2804_v24 = vpop.permute.xlu1 %2803  ;;  %7948 = vmatmul.mubr.msk.f32.vlgmr.msra.gmra.mrb[2].mxu0 %vm2019_vm13, %v7947_v20 }
 0x23a   : > { %8178 = vmatpush3.msra.mxu1 %v2015_v23  ;;  %2661 = vmatpush1.msra.mxu0 %v2652_v22  ;;  %v2810_v25 = vsel %vm1322_vm8, %v2804_v24, %v2806_v17 }
 0x23b   : > { %2818 = vmatprep.subr.mxu0 %v2810_v25  ;;  %8180 = vmatmul.mubr.msk.f32.vlgmr.msra.gmra.mrb[18].mxu1 %vm2019_vm13, %v7935_v61 }
 0x23c   : > { %2724 = vmatprep.mubr.f32.mxu0 %v8472_v0  ;;  %8182 = vmatprep.subr.mxu1 %v8472_v0  ;;  %v2962_v28 = vpop.permute.xlu0 %2961 }
 0x23d   : > { %v2802_v26 = vpop.permute.xlu1 %2801  ;;  %8184 = vmatprep.mubr.msk.f32.mxu1 %vm8478_vm0, %v8472_v0 }
 0x23e   : > { %v2809_v29 = vsel %vm1322_vm8, %v2802_v26, %v2804_v24 }
 0x240   : > { %v2960_v33 = vpop.permute.xlu0 %2959 }
 0x241   : > { %v2175_v30 = vpop.permute.xlu1 %2174  ;;  %7951 = vmatmul.mubr.msk.f32.vlgmr.msra.gmra.mrb[2].mxu0 %vm2019_vm13, %v7950_v27  ;;  %v2967_v38 = vsel %vm1484_vm9, %v2960_v33, %v2962_v28 }
 0x242   : > { %v2178_v31 = vsel %vm658_vm3, %v8842_v57, %v2175_v30  ;;  %2819 = vmatpush1.msra.mxu0 %v2809_v29  ;;  %2882 = vmatprep.mubr.f32.mxu0 %v8472_v0 }
 0x243   : > { %8183 = vmatpush3.msra.mxu1 %v2178_v31  ;;  %v4879_v31 = vld [vmem:[%s9506_s8] sm:$0xff] }
 0x244   : > { %8185 = vmatmul.mubr.msk.f32.vlgmr.msra.gmra.mrb[20].mxu1 %vm2019_vm13, %v7939_v5  ;;  %8187 = vmatprep.subr.mxu1 %v8472_v0  ;;  %v3264_v44 = vpop.permute.xlu0 %3263 }
 0x245   : > { %v2964_v32 = vpop.permute.xlu1 %2963  ;;  %8188 = vmatpush3.msra.mxu1 %v2335_v7  ;;  %8189 = vmatprep.mubr.msk.f32.mxu1 %vm8478_vm0, %v8472_v0 }
 0x246   : > { %8192 = vmatprep.subr.mxu1 %v8472_v0  ;;  %v2968_v34 = vsel %vm1484_vm9, %v2962_v28, %v2964_v32 }
 0x247   : > { %2976 = vmatprep.subr.mxu0 %v2968_v34 }
 0x248   : > { %8190 = vmatmul.mubr.msk.f32.vlgmr.msra.gmra.mrb[22].mxu1 %vm2019_vm13, %v7943_v13  ;;  %v3262_v52 = vpop.permute.xlu0 %3261 }
 0x249   : > { %8193 = vmatpush3.msra.mxu1 %v2494_v6  ;;  %v2808_v39 = vpop.permute.xlu1 %2807  ;;  %7953 = vmatmul.mubr.msk.f32.vlgmr.msra.gmra.mrb[2].mxu0 %vm2019_vm13, %v1998_v35  ;;  %v3267_v54 = vsel %vm1794_vm10, %v3262_v52, %v3264_v44 }
 0x24a   : > { %2977 = vmatpush1.msra.mxu0 %v2967_v38  ;;  %8194 = vmatprep.mubr.msk.f32.mxu1 %vm8478_vm0, %v8472_v0  ;;  %v2811_v45 = vsel %vm1322_vm8, %v2806_v17, %v2808_v39  ;;  %v7961_v38 = vld [vmem:[%s9505_s7 + $0x8] sm:$0xff] }
 0x24b   : > { %3120 = vmatprep.subr.mxu0 %v8774_v48  ;;  %8197 = vmatprep.subr.mxu1 %v8472_v0 }
 0x24c   : > { %8195 = vmatmul.mubr.msk.f32.vlgmr.msra.gmra.mrb[24].mxu1 %vm2019_vm13, %v7947_v20  ;;  %3040 = vmatprep.mubr.f32.mxu0 %v8472_v0 }
 0x24d   : > { %8198 = vmatpush3.msra.mxu1 %v2651_v18  ;;  %v3266_v42 = vpop.permute.xlu1 %3265  ;;  %8199 = vmatprep.mubr.msk.f32.mxu1 %vm8478_vm0, %v8472_v0 }
 0x24e   : > { %8202 = vmatprep.subr.mxu1 %v8472_v0  ;;  %v3268_v51 = vsel %vm1794_vm10, %v3264_v44, %v3266_v42 }
 0x250   : > { %8200 = vmatmul.mubr.msk.f32.vlgmr.msra.gmra.mrb[26].mxu1 %vm2019_vm13, %v7950_v27 }
 0x251   : > { %8203 = vmatpush3.msra.mxu1 %v2811_v45  ;;  %v2966_v47 = vpop.permute.xlu1 %2965  ;;  %7955 = vmatmul.mubr.msk.f32.vlgmr.msra.gmra.mrb[2].mxu0 %vm2019_vm13, %v7938_v43 }
 0x252   : > { %v2969_v48 = vsel %vm1484_vm9, %v2964_v32, %v2966_v47  ;;  %3121 = vmatpush1.msra.mxu0 %v8771_v46  ;;  %8204 = vmatprep.mubr.msk.f32.mxu1 %vm8478_vm0, %v8472_v0  ;;  %v7942_v46 = vld [vmem:[%s9503_s5 + $0x20] sm:$0xff] }
 0x253   : > { %3275 = vmatprep.subr.mxu0 %v3268_v51  ;;  %8207 = vmatprep.subr.mxu1 %v8472_v0  ;;  %v7965_v51 = vld [vmem:[%s9505_s7 + $0x18] sm:$0xff] }
 0x254   : > { %8205 = vmatmul.mubr.msk.f32.vlgmr.msra.gmra.mrb[28].mxu1 %vm2019_vm13, %v1998_v35  ;;  %3184 = vmatprep.mubr.f32.mxu0 %v8472_v0 }
 0x255   : > { %8208 = vmatpush3.msra.mxu1 %v2969_v48  ;;  %8209 = vmatprep.mubr.msk.f32.mxu1 %vm8478_vm0, %v8472_v0 }
 0x256   : > { %8212 = vmatprep.subr.mxu1 %v8472_v0 }
 0x258   : > { %8210 = vmatmul.mubr.msk.f32.vlgmr.msra.gmra.mrb[30].mxu1 %vm2019_vm13, %v7938_v43 }
 0x259   : > { %8213 = vmatpush3.msra.mxu1 %v8797_v53  ;;  %7957 = vmatmul.mubr.msk.f32.vlgmr.msra.gmra.mrb[2].mxu0 %vm2019_vm13, %v7942_v46  ;;  %v7946_v53 = vld [vmem:[%s9503_s5 + $0x30] sm:$0xff]  ;;  %v3432_v12 = vpop.permute.xlu0 %3431 }
 0x25a   : > { %3276 = vmatpush1.msra.mxu0 %v3267_v54  ;;  %8214 = vmatprep.mubr.msk.f32.mxu1 %vm8478_vm0, %v8472_v0 }
 0x25b   : > { %8217 = vmatprep.subr.mxu1 %v8472_v0  ;;  %3339 = vmatprep.mubr.f32.mxu0 %v8472_v0 }
 0x25c   : > { %8215 = vmatmul.mubr.msk.f32.vlgmr.msra.gmra.mrb[32].mxu1 %vm2019_vm13, %v7942_v46 }
 0x25d   : > { %8218 = vmatpush3.msra.mxu1 %v3266_v42  ;;  %8219 = vmatprep.mubr.msk.f32.mxu1 %vm8478_vm0, %v8472_v0 }
 0x25e   : > { %8222 = vmatprep.subr.mxu1 %v8472_v0 }
 0x260   : > { %8220 = vmatmul.mubr.msk.f32.vlgmr.msra.gmra.mrb[34].mxu1 %vm2019_vm13, %v7946_v53 }
 0x261   : > { %7959 = vmatmul.mubr.msk.f32.vlgmr.msra.gmra.mrb[2].mxu0 %vm2019_vm13, %v7946_v53  ;;  %8224 = vmatprep.mubr.msk.f32.mxu1 %vm8478_vm0, %v8472_v0 }
 0x262   : > { %3538 = vmatprep.mubr.f32.mxu0 %v8472_v0 }
 0x30e   : > { %v2160_v55 = vpop.f32.mrb[18].mxu1 }
 0x30f   : > { %v8181_v56 = vpop.f32.mrb[19].mxu1 }
 0x317   : > { %v2322_v57 = vpop.f32.mrb[20].mxu1 }
 0x318   : > { %v8186_v58 = vpop.f32.mrb[21].mxu1 }
 0x31b   : > { %v2481_v59 = vpop.f32.mrb[22].mxu1 }
 0x31c   : > { %v8191_v60 = vpop.f32.mrb[23].mxu1 }
 0x31f   : > { %v2640_v61 = vpop.f32.mrb[24].mxu1 }
 0x320   : > { %v8196_v62 = vpop.f32.mrb[25].mxu1 }
 0x323   : > { %v2797_v63 = vpop.f32.mrb[26].mxu1 }
 0x324   : > { %v8201_v1 = vpop.f32.mrb[27].mxu1 }
 0x327   : > { %v2955_v2 = vpop.f32.mrb[28].mxu1 }
 0x328   : > { %v2956_v3 = vadd.f32 %v2955_v2, %v2160_v55  ;;  %v8206_v4 = vpop.f32.mrb[29].mxu1  ;;  %v7973_v2 = vld [vmem:[%s9505_s7 + $0x38] sm:$0xff] }
 0x32b   : > { %v3113_v5 = vpop.f32.mrb[30].mxu1 }
 0x32c   : > { %v3114_v6 = vadd.f32 %v3113_v5, %v2322_v57  ;;  %v8211_v7 = vpop.f32.mrb[31].mxu1  ;;  %v7969_v57 = vld [vmem:[%s9505_s7 + $0x28] sm:$0xff] }
 0x32e   : > { %v3418_v8 = vadd.f32 %v3114_v6, %v2956_v3 }
 0x32f   : > { %v3257_v9 = vpop.f32.mrb[32].mxu1 }
 0x330   : > { %v3258_v10 = vadd.f32 %v3257_v9, %v2481_v59  ;;  %v8216_v11 = vpop.f32.mrb[33].mxu1 }
 0x333   : > { %v3412_v13 = vpop.f32.mrb[34].mxu1 }
 0x334   : > { %v3413_v14 = vadd.f32 %v3412_v13, %v2640_v61  ;;  %v3341_v15 = vpop.f32.mrb[2].mxu0  ;;  %v8221_v16 = vpop.f32.mrb[35].mxu1 }
 0x335   : > { %v3434_v17 = vadd.f32 %v3432_v12, %v3341_v15  ;;  %v3343_v18 = vpop.f32.mrb[3].mxu0 }
 0x336   : > { %v3421_v19 = vadd.f32 %v3413_v14, %v3258_v10  ;;  %v3435_v20 = vadd.f32 %v3432_v12, %v3343_v18  ;;  %v7976_v10 = vld [vmem:[%s9505_s7 + $0x40] sm:$0xff] }
 0x337   : > { %v3437_v21 = vmax.f32 %v3434_v17, 0.0  ;;  %v3450_v18 = vld [vmem:[%s9505_s7] sm:$0xff] }
 0x338   : > { %v3424_v22 = vadd.f32 %v3421_v19, %v3418_v8  ;;  %v3438_v23 = vmax.f32 %v3435_v20, 0.0 }
 0x339   : > { %v8951_v24 = vmul.f32 %v3437_v21, %v8760_v36 }
 0x33a   : > { %v3427_v25 = vadd.f32 %v3424_v22, %v2797_v63  ;;  %v8954_v26 = vmul.f32 %v3438_v23, %v8766_v41  ;;  %v7964_v22 = vld [vmem:[%s9505_s7 + $0x10] sm:$0xff] }
 0x33b   : > { %3459 = vrot.lane.b32.xlu1 %v8951_v24, %s8473_s14 }
 0x33c   : > { %v3436_v27 = vadd.f32 %v3432_v12, %v3427_v25  ;;  %3461 = vrot.lane.b32.xlu0 %v8954_v26, %s8473_s14 }
 0x33e   : > { %v3439_v28 = vmax.f32 %v3436_v27, 0.0 }
 0x33f   : > { %3457 = vrot.lane.b32.xlu1 %v8472_v0, %s8473_s14 }
 0x340   : > { %v3442_v29 = vmul.f32 %v3439_v28, %v8778_v49  ;;  %3621 = vrot.lane.b32.xlu0 %v8951_v24, %s8474_s15 }
 0x342   : > { %3445 = vst.msk [vmem:[#allocation2 + $0x18] sm:$0xff] %vm1992_vm12, %v3442_v29 }
 0x343   : > { %3623 = vrot.lane.b32.xlu1 %v8954_v26, %s8474_s15 }
 0x344   : > { %3619 = vrot.lane.b32.xlu0 %v8472_v0, %s8474_s15 }
 0x347   : > { %3783 = vrot.lane.b32.xlu1 %v8954_v26, %s8475_s16 }
 0x349   : > { %v8972_v30 = vld [vmem:[#allocation2 + $0x18] sm:$0xff] }
 0x34a   : > { %3785 = vrot.lane.b32.xlu0 %v8972_v30, %s8475_s16 }
 0x34b   : > { %3781 = vrot.lane.b32.xlu1 %v8951_v24, %s8475_s16 }
 0x34e   : > { %3942 = vrot.lane.b32.xlu0 %v8954_v26, %s8476_s17 }
 0x34f   : > { %3944 = vrot.lane.b32.xlu1 %v8972_v30, %s8476_s17 }
 0x352   : > { %3940 = vrot.lane.b32.xlu0 %v8951_v24, %s8476_s17 }
 0x353   : > { %4099 = vrot.lane.b32.xlu1 %v8954_v26, %s8477_s18 }
 0x356   : > { %4101 = vrot.lane.b32.xlu0 %v8972_v30, %s8477_s18 }
 0x357   : > { %4097 = vrot.lane.b32.xlu1 %v8951_v24, %s8477_s18 }
 0x35a   : > { %4254 = vrot.lane.b32.xlu0 %v8951_v24, %s8479_s19 }
 0x35b   : > { %4256 = vrot.lane.b32.xlu1 %v8954_v26, %s8479_s19 }
 0x35e   : > { %4252 = vrot.lane.b32.xlu0 %v8472_v0, %s8479_s19 }
 0x35f   : > { %3463 = vrot.lane.b32.xlu1 %v8972_v30, %s8473_s14 }
 0x362   : > { %3625 = vrot.lane.b32.xlu0 %v8972_v30, %s8474_s15 }
 0x363   : > { %4412 = vrot.lane.b32.xlu1 %v8951_v24, %s8480_s20 }
 0x366   : > { %4414 = vrot.lane.b32.xlu0 %v8954_v26, %s8480_s20 }
 0x367   : > { %4410 = vrot.lane.b32.xlu1 %v8472_v0, %s8480_s20 }
 0x36a   : > { %4258 = vrot.lane.b32.xlu0 %v8972_v30, %s8479_s19 }
 0x36b   : > { %4714 = vrot.lane.b32.xlu1 %v8954_v26, %s8481_s21 }
 0x36e   : > { %4716 = vrot.lane.b32.xlu0 %v8972_v30, %s8481_s21 }
 0x36f   : > { %4712 = vrot.lane.b32.xlu1 %v8951_v24, %s8481_s21 }
 0x372   : > { %4416 = vrot.lane.b32.xlu0 %v8972_v30, %s8480_s20 }
 0x373   : > { %4882 = vperm.xlu1 %8458, %v4879_v31  }
 0x3ad   : > { %v3460_v32 = vpop.permute.xlu1 %3459 }
 0x3ae   : > { %v3462_v33 = vpop.permute.xlu0 %3461 }
 0x3af   : > { %v3466_v34 = vsel %vm484_vm1, %v3460_v32, %v3462_v33 }
 0x3b0   : > { %3474 = vmatprep.subr.mxu0 %v3466_v34 }
 0x3b1   : > { %v3458_v35 = vpop.permute.xlu1 %3457 }
 0x3b2   : > { %v3465_v39 = vsel %vm484_vm1, %v3458_v35, %v3460_v32  ;;  %v3622_v42 = vpop.permute.xlu0 %3621  ;;  %v7972_v32 = vld [vmem:[%s9505_s7 + $0x30] sm:$0xff] }
 0x3b3   : > { %3475 = vmatpush1.msra.mxu0 %v3465_v39 }
 0x3b4   : > { %7962 = vmatmul.mubr.msk.f32.vlgmr.msra.gmra.mrb[4].mxu0 %vm2019_vm13, %v7961_v38 }
 0x3b5   : > { %v3624_v43 = vpop.permute.xlu1 %3623  ;;  %3700 = vmatprep.mubr.f32.mxu0 %v8472_v0 }
 0x3b6   : > { %v3620_v44 = vpop.permute.xlu0 %3619  ;;  %v3628_v45 = vsel %vm658_vm3, %v3622_v42, %v3624_v43 }
 0x3b7   : > { %v3627_v47 = vsel %vm658_vm3, %v3620_v44, %v3622_v42  ;;  %3636 = vmatprep.subr.mxu0 %v3628_v45 }
 0x3b8   : > { %3637 = vmatpush1.msra.mxu0 %v3627_v47 }
 0x3b9   : > { %v3784_v48 = vpop.permute.xlu1 %3783 }
 0x3bc   : > { %v3786_v52 = vpop.permute.xlu0 %3785  ;;  %7966 = vmatmul.mubr.msk.f32.vlgmr.msra.gmra.mrb[4].mxu0 %vm2019_vm13, %v7965_v51 }
 0x3bd   : > { %v3788_v46 = vsel %vm827_vm5, %v3784_v48, %v3786_v52  ;;  %v3782_v54 = vpop.permute.xlu1 %3781  ;;  %3859 = vmatprep.mubr.f32.mxu0 %v8472_v0  ;;  %v9041_v0 = vld [vmem:[#allocation2] sm:$0xff] }
 0x3be   : > { %3795 = vmatprep.subr.mxu0 %v3788_v46  ;;  %v3787_v53 = vsel %vm827_vm5, %v3782_v54, %v3784_v48 }
 0x3bf   : > { %3796 = vmatpush1.msra.mxu0 %v3787_v53 }
 0x3c0   : > { %v3943_v55 = vpop.permute.xlu0 %3942 }
 0x3c1   : > { %v3945_v56 = vpop.permute.xlu1 %3944 }
 0x3c2   : > { %v3947_v58 = vsel %vm995_vm6, %v3943_v55, %v3945_v56 }
 0x3c3   : > { %3954 = vmatprep.subr.mxu0 %v3947_v58 }
 0x3c4   : > { %v3941_v59 = vpop.permute.xlu0 %3940  ;;  %7970 = vmatmul.mubr.msk.f32.vlgmr.msra.gmra.mrb[4].mxu0 %vm2019_vm13, %v7969_v57 }
 0x3c5   : > { %v3946_v60 = vsel %vm995_vm6, %v3941_v59, %v3943_v55  ;;  %v4100_v61 = vpop.permute.xlu1 %4099  ;;  %4018 = vmatprep.mubr.f32.mxu0 %v9041_v0 }
 0x3c6   : > { %3955 = vmatpush1.msra.mxu0 %v3946_v60 }
 0x3c8   : > { %v4102_v62 = vpop.permute.xlu0 %4101 }
 0x3c9   : > { %v4104_v63 = vsel %vm1161_vm7, %v4100_v61, %v4102_v62  ;;  %v4098_v1 = vpop.permute.xlu1 %4097 }
 0x3ca   : > { %4111 = vmatprep.subr.mxu0 %v4104_v63  ;;  %v4103_v3 = vsel %vm1161_vm7, %v4098_v1, %v4100_v61 }
 0x3cc   : > { %v4255_v4 = vpop.permute.xlu0 %4254  ;;  %7974 = vmatmul.mubr.msk.f32.vlgmr.msra.gmra.mrb[4].mxu0 %vm2019_vm13, %v7973_v2 }
 0x3cd   : > { %4112 = vmatpush1.msra.mxu0 %v4103_v3  ;;  %v4257_v5 = vpop.permute.xlu1 %4256  ;;  %4175 = vmatprep.mubr.f32.mxu0 %v9041_v0  ;;  %v4891_v3 = vld [vmem:[%s455_s24] sm:$0xff] }
 0x3ce   : > { %v4261_v6 = vsel %vm1322_vm8, %v4255_v4, %v4257_v5 }
 0x3cf   : > { %4269 = vmatprep.subr.mxu0 %v4261_v6  ;;  %v4892_v6 = vld [vmem:[%s455_s24 + $0x8] sm:$0xff] }
 0x3d0   : > { %v4253_v7 = vpop.permute.xlu0 %4252 }
 0x3d1   : > { %v3464_v8 = vpop.permute.xlu1 %3463  ;;  %v4260_v12 = vsel %vm1322_vm8, %v4253_v7, %v4255_v4 }
 0x3d2   : > { %v3467_v9 = vsel %vm484_vm1, %v3462_v33, %v3464_v8 }
 0x3d3   : > { %8223 = vmatpush3.msra.mxu1 %v3467_v9 }
 0x3d4   : > { %v3626_v11 = vpop.permute.xlu0 %3625  ;;  %8225 = vmatmul.mubr.msk.f32.vlgmr.msra.gmra.mrb[36].mxu1 %vm2019_vm13, %v7961_v38  ;;  %8227 = vmatprep.subr.mxu1 %v9041_v0 }
 0x3d5   : > { %v3629_v13 = vsel %vm658_vm3, %v3624_v43, %v3626_v11  ;;  %7977 = vmatmul.mubr.msk.f32.vlgmr.msra.gmra.mrb[4].mxu0 %vm2019_vm13, %v7976_v10  ;;  %v4413_v14 = vpop.permute.xlu1 %4412  ;;  %8229 = vmatprep.mubr.msk.f32.mxu1 %vm8478_vm0, %v9041_v0 }
 0x3d6   : > { %4270 = vmatpush1.msra.mxu0 %v4260_v12  ;;  %8228 = vmatpush3.msra.mxu1 %v3629_v13 }
 0x3d7   : > { %8232 = vmatprep.subr.mxu1 %v9041_v0  ;;  %4333 = vmatprep.mubr.f32.mxu0 %v9041_v0 }
 0x3d8   : > { %v4415_v15 = vpop.permute.xlu0 %4414  ;;  %8230 = vmatmul.mubr.msk.f32.vlgmr.msra.gmra.mrb[38].mxu1 %vm2019_vm13, %v7965_v51 }
 0x3d9   : > { %8233 = vmatpush3.msra.mxu1 %v3786_v52  ;;  %v4419_v16 = vsel %vm1484_vm9, %v4413_v14, %v4415_v15  ;;  %v4411_v17 = vpop.permute.xlu1 %4410  ;;  %8234 = vmatprep.mubr.msk.f32.mxu1 %vm8478_vm0, %v9041_v0 }
 0x3da   : > { %4427 = vmatprep.subr.mxu0 %v4419_v16  ;;  %8237 = vmatprep.subr.mxu1 %v9041_v0  ;;  %v4418_v19 = vsel %vm1484_vm9, %v4411_v17, %v4413_v14 }
 0x3dc   : > { %v4259_v20 = vpop.permute.xlu0 %4258  ;;  %8235 = vmatmul.mubr.msk.f32.vlgmr.msra.gmra.mrb[40].mxu1 %vm2019_vm13, %v7969_v57 }
 0x3dd   : > { %8238 = vmatpush3.msra.mxu1 %v3945_v56  ;;  %7979 = vmatmul.mubr.msk.f32.vlgmr.msra.gmra.mrb[4].mxu0 %vm2019_vm13, %v3450_v18  ;;  %v4262_v23 = vsel %vm1322_vm8, %v4257_v5, %v4259_v20  ;;  %v4715_v25 = vpop.permute.xlu1 %4714  ;;  %v6339_v20 = vld [vmem:[%s9508_s10] sm:$0xff] }
 0x3de   : > { %4428 = vmatpush1.msra.mxu0 %v4418_v19  ;;  %8239 = vmatprep.mubr.msk.f32.mxu1 %vm8478_vm0, %v9041_v0 }
 0x3df   : > { %4571 = vmatprep.subr.mxu0 %v8954_v26  ;;  %8242 = vmatprep.subr.mxu1 %v9041_v0 }
 0x3e0   : > { %v4717_v21 = vpop.permute.xlu0 %4716  ;;  %8240 = vmatmul.mubr.msk.f32.vlgmr.msra.gmra.mrb[42].mxu1 %vm2019_vm13, %v7973_v2  ;;  %4491 = vmatprep.mubr.f32.mxu0 %v9041_v0 }
 0x3e1   : > { %8243 = vmatpush3.msra.mxu1 %v4102_v62  ;;  %8244 = vmatprep.mubr.msk.f32.mxu1 %vm8478_vm0, %v9041_v0  ;;  %v4719_v27 = vsel %vm1794_vm10, %v4715_v25, %v4717_v21  ;;  %v4713_v29 = vpop.permute.xlu1 %4712 }
 0x3e2   : > { %8247 = vmatprep.subr.mxu1 %v9041_v0  ;;  %v4718_v31 = vsel %vm1794_vm10, %v4713_v29, %v4715_v25 }
 0x3e4   : > { %8245 = vmatmul.mubr.msk.f32.vlgmr.msra.gmra.mrb[44].mxu1 %vm2019_vm13, %v7976_v10  ;;  %v4417_v26 = vpop.permute.xlu0 %4416 }
 0x3e5   : > { %8248 = vmatpush3.msra.mxu1 %v4262_v23  ;;  %7981 = vmatmul.mubr.msk.f32.vlgmr.msra.gmra.mrb[4].mxu0 %vm2019_vm13, %v7964_v22  ;;  %v4420_v28 = vsel %vm1484_vm9, %v4415_v15, %v4417_v26  ;;  %v4893_v15 = vld [vmem:[%s455_s24 + $0x10] sm:$0xff]  ;;  %v7987_v26 = vld [vmem:[%s9507_s9 + $0x8] sm:$0xff] }
 0x3e6   : > { %4572 = vmatpush1.msra.mxu0 %v8951_v24  ;;  %8249 = vmatprep.mubr.msk.f32.mxu1 %vm8478_vm0, %v9041_v0  ;;  %v7968_v24 = vld [vmem:[%s9505_s7 + $0x20] sm:$0xff] }
 0x3e7   : > { %4726 = vmatprep.subr.mxu0 %v4719_v27  ;;  %8252 = vmatprep.subr.mxu1 %v9041_v0 }
 0x3e8   : > { %8250 = vmatmul.mubr.msk.f32.vlgmr.msra.gmra.mrb[46].mxu1 %vm2019_vm13, %v3450_v18  ;;  %4635 = vmatprep.mubr.f32.mxu0 %v9041_v0 }
 0x3e9   : > { %8253 = vmatpush3.msra.mxu1 %v4420_v28  ;;  %8254 = vmatprep.mubr.msk.f32.mxu1 %vm8478_vm0, %v9041_v0 }
 0x3ea   : > { %8257 = vmatprep.subr.mxu1 %v9041_v0 }
 0x3ec   : > { %8255 = vmatmul.mubr.msk.f32.vlgmr.msra.gmra.mrb[48].mxu1 %vm2019_vm13, %v7964_v22 }
 0x3ed   : > { %7983 = vmatmul.mubr.msk.f32.vlgmr.msra.gmra.mrb[4].mxu0 %vm2019_vm13, %v7968_v24  ;;  %8258 = vmatpush3.msra.mxu1 %v8972_v30 }
 0x3ee   : > { %4727 = vmatpush1.msra.mxu0 %v4718_v31  ;;  %8259 = vmatprep.mubr.msk.f32.mxu1 %vm8478_vm0, %v9041_v0 }
 0x3ef   : > { %8262 = vmatprep.subr.mxu1 %v9041_v0  ;;  %4790 = vmatprep.mubr.f32.mxu0 %v9041_v0 }
 0x3f0   : > { %8260 = vmatmul.mubr.msk.f32.vlgmr.msra.gmra.mrb[50].mxu1 %vm2019_vm13, %v7968_v24 }
 0x3f1   : > { %8263 = vmatpush3.msra.mxu1 %v4717_v21  ;;  %8264 = vmatprep.mubr.msk.f32.mxu1 %vm8478_vm0, %v9041_v0 }
 0x3f2   : > { %8267 = vmatprep.subr.mxu1 %v9041_v0  ;;  %v4883_v58 = vpop.permute.xlu1 %4882 }
 0x3f4   : > { %8265 = vmatmul.mubr.msk.f32.vlgmr.msra.gmra.mrb[52].mxu1 %vm2019_vm13, %v7972_v32 }
 0x3f5   : > { %7985 = vmatmul.mubr.msk.f32.vlgmr.msra.gmra.mrb[4].mxu0 %vm2019_vm13, %v7972_v32  ;;  %8269 = vmatprep.mubr.msk.f32.mxu1 %vm8478_vm0, %v9041_v0 }
 0x3f6   : > { %4998 = vmatprep.mubr.f32.mxu0 %v9041_v0 }
 0x4a7   : > { %v3611_v30 = vpop.f32.mrb[36].mxu1 }
 0x4a8   : > { %v8226_v33 = vpop.f32.mrb[37].mxu1 }
 0x4a9   : > { %v7991_v33 = vld [vmem:[%s9507_s9 + $0x18] sm:$0xff] }
 0x4ab   : > { %v3773_v34 = vpop.f32.mrb[38].mxu1 }
 0x4ac   : > { %v8231_v35 = vpop.f32.mrb[39].mxu1 }
 0x4af   : > { %v3932_v38 = vpop.f32.mrb[40].mxu1 }
 0x4b0   : > { %v8236_v39 = vpop.f32.mrb[41].mxu1 }
 0x4b3   : > { %v4091_v42 = vpop.f32.mrb[42].mxu1 }
 0x4b4   : > { %v8241_v43 = vpop.f32.mrb[43].mxu1 }
 0x4b7   : > { %v4248_v44 = vpop.f32.mrb[44].mxu1 }
 0x4b8   : > { %v8246_v45 = vpop.f32.mrb[45].mxu1 }
 0x4bb   : > { %v4406_v47 = vpop.f32.mrb[46].mxu1 }
 0x4bc   : > { %v4407_v48 = vadd.f32 %v4406_v47, %v3611_v30  ;;  %v8251_v51 = vpop.f32.mrb[47].mxu1 }
 0x4bf   : > { %v4564_v52 = vpop.f32.mrb[48].mxu1 }
 0x4c0   : > { %v4565_v46 = vadd.f32 %v4564_v52, %v3773_v34  ;;  %v8256_v54 = vpop.f32.mrb[49].mxu1 }
 0x4c2   : > { %v4869_v53 = vadd.f32 %v4565_v46, %v4407_v48 }
 0x4c3   : > { %v4708_v55 = vpop.f32.mrb[50].mxu1 }
 0x4c4   : > { %v4709_v56 = vadd.f32 %v4708_v55, %v3932_v38  ;;  %v8261_v57 = vpop.f32.mrb[51].mxu1 }
 0x4c7   : > { %v4863_v59 = vpop.f32.mrb[52].mxu1 }
 0x4c8   : > { %v4792_v60 = vpop.f32.mrb[4].mxu0  ;;  %v4864_v61 = vadd.f32 %v4863_v59, %v4091_v42  ;;  %v8266_v62 = vpop.f32.mrb[53].mxu1 }
 0x4c9   : > { %v4885_v63 = vadd.f32 %v4883_v58, %v4792_v60  ;;  %v4794_v1 = vpop.f32.mrb[5].mxu0  ;;  %v8002_v62 = vld [vmem:[%s9507_s9 + $0x40] sm:$0xff] }
 0x4ca   : > { %v4872_v2 = vadd.f32 %v4864_v61, %v4709_v56  ;;  %v4886_v4 = vadd.f32 %v4883_v58, %v4794_v1 }
 0x4cb   : > { %v4888_v5 = vadd.f32 %v4885_v63, %v8762_v37 }
 0x4cc   : > { %v4875_v7 = vadd.f32 %v4872_v2, %v4869_v53  ;;  %v4889_v8 = vadd.f32 %v4886_v4, %v8764_v40  ;;  %v7999_v53 = vld [vmem:[%s9507_s9 + $0x38] sm:$0xff] }
 0x4cd   : > { %v9133_v9 = vadd.f32 %v4891_v3, %v4888_v5 }
 0x4ce   : > { %v4878_v10 = vadd.f32 %v4875_v7, %v4248_v44  ;;  %v9135_v11 = vadd.f32 %v4892_v6, %v4889_v8  ;;  %v7995_v44 = vld [vmem:[%s9507_s9 + $0x28] sm:$0xff]  ;;  %v4910_v7 = vld [vmem:[%s9507_s9] sm:$0xff] }
 0x4cf   : > { %v4897_v12 = vmax.f32 %v9133_v9, 0.0 }
 0x4d0   : > { %v4887_v13 = vadd.f32 %v4883_v58, %v4878_v10  ;;  %v4898_v14 = vmax.f32 %v9135_v11, 0.0 }
 0x4d1   : > { %v9140_v16 = vmul.f32 %v4897_v12, %v8760_v36 }
 0x4d2   : > { %v4890_v37 = vadd.f32 %v4887_v13, %v8780_v50  ;;  %v9144_v17 = vmul.f32 %v4898_v14, %v8766_v41  ;;  %v7990_v13 = vld [vmem:[%s9507_s9 + $0x10] sm:$0xff] }
 0x4d3   : > { %4919 = vrot.lane.b32.xlu0 %v9140_v16, %s8473_s14 }
 0x4d4   : > { %v9148_v40 = vadd.f32 %v4893_v15, %v4890_v37  ;;  %4921 = vrot.lane.b32.xlu1 %v9144_v17, %s8473_s14 }
 0x4d6   : > { %v4899_v18 = vmax.f32 %v9148_v40, 0.0 }
 0x4d7   : > { %4917 = vrot.lane.b32.xlu0 %v9041_v0, %s8473_s14 }
 0x4d8   : > { %v4902_v19 = vmul.f32 %v4899_v18, %v8778_v49  ;;  %5081 = vrot.lane.b32.xlu1 %v9140_v16, %s8474_s15 }
 0x4da   : > { %4905 = vst.msk [vmem:[#allocation3 + $0x18] sm:$0xff] %vm1992_vm12, %v4902_v19 }
 0x4db   : > { %5083 = vrot.lane.b32.xlu0 %v9144_v17, %s8474_s15 }
 0x4dc   : > { %5079 = vrot.lane.b32.xlu1 %v9041_v0, %s8474_s15 }
 0x4df   : > { %5243 = vrot.lane.b32.xlu0 %v9144_v17, %s8475_s16 }
 0x4e1   : > { %v9165_v50 = vld [vmem:[#allocation3 + $0x18] sm:$0xff] }
 0x4e2   : > { %5245 = vrot.lane.b32.xlu1 %v9165_v50, %s8475_s16 }
 0x4e3   : > { %5241 = vrot.lane.b32.xlu0 %v9140_v16, %s8475_s16 }
 0x4e6   : > { %5402 = vrot.lane.b32.xlu1 %v9144_v17, %s8476_s17 }
 0x4e7   : > { %5404 = vrot.lane.b32.xlu0 %v9165_v50, %s8476_s17 }
 0x4ea   : > { %5400 = vrot.lane.b32.xlu1 %v9140_v16, %s8476_s17 }
 0x4eb   : > { %5559 = vrot.lane.b32.xlu0 %v9144_v17, %s8477_s18 }
 0x4ee   : > { %5561 = vrot.lane.b32.xlu1 %v9165_v50, %s8477_s18 }
 0x4ef   : > { %5557 = vrot.lane.b32.xlu0 %v9140_v16, %s8477_s18 }
 0x4f2   : > { %5714 = vrot.lane.b32.xlu1 %v9140_v16, %s8479_s19 }
 0x4f3   : > { %5716 = vrot.lane.b32.xlu0 %v9144_v17, %s8479_s19 }
 0x4f6   : > { %5712 = vrot.lane.b32.xlu1 %v9041_v0, %s8479_s19 }
 0x4f7   : > { %4923 = vrot.lane.b32.xlu0 %v9165_v50, %s8473_s14 }
 0x4fa   : > { %5085 = vrot.lane.b32.xlu1 %v9165_v50, %s8474_s15 }
 0x4fb   : > { %5872 = vrot.lane.b32.xlu0 %v9140_v16, %s8480_s20 }
 0x4fe   : > { %5874 = vrot.lane.b32.xlu1 %v9144_v17, %s8480_s20 }
 0x4ff   : > { %5870 = vrot.lane.b32.xlu0 %v9041_v0, %s8480_s20 }
 0x502   : > { %5718 = vrot.lane.b32.xlu1 %v9165_v50, %s8479_s19 }
 0x503   : > { %6174 = vrot.lane.b32.xlu0 %v9144_v17, %s8481_s21 }
 0x506   : > { %6176 = vrot.lane.b32.xlu1 %v9165_v50, %s8481_s21 }
 0x507   : > { %6172 = vrot.lane.b32.xlu0 %v9140_v16, %s8481_s21 }
 0x50a   : > { %5876 = vrot.lane.b32.xlu1 %v9165_v50, %s8480_s20 }
 0x50b   : > { %6342 = vperm.xlu0 %8457, %v6339_v20  }
 0x545   : > { %v4920_v21 = vpop.permute.xlu0 %4919 }
 0x546   : > { %v4922_v22 = vpop.permute.xlu1 %4921 }
 0x547   : > { %v4926_v23 = vsel %vm484_vm1, %v4920_v21, %v4922_v22 }
 0x548   : > { %4934 = vmatprep.subr.mxu0 %v4926_v23 }
 0x549   : > { %v4918_v25 = vpop.permute.xlu0 %4917 }
 0x54a   : > { %v4925_v27 = vsel %vm484_vm1, %v4918_v25, %v4920_v21  ;;  %v5082_v28 = vpop.permute.xlu1 %5081  ;;  %v7998_v21 = vld [vmem:[%s9507_s9 + $0x30] sm:$0xff] }
 0x54b   : > { %4935 = vmatpush1.msra.mxu0 %v4925_v27 }
 0x54c   : > { %7988 = vmatmul.mubr.msk.f32.vlgmr.msra.gmra.mrb[6].mxu0 %vm2019_vm13, %v7987_v26 }
 0x54d   : > { %v5084_v29 = vpop.permute.xlu0 %5083  ;;  %5160 = vmatprep.mubr.f32.mxu0 %v9041_v0 }
 0x54e   : > { %v5080_v24 = vpop.permute.xlu1 %5079  ;;  %v5088_v31 = vsel %vm658_vm3, %v5082_v28, %v5084_v29 }
 0x54f   : > { %v5087_v32 = vsel %vm658_vm3, %v5080_v24, %v5082_v28  ;;  %5096 = vmatprep.subr.mxu0 %v5088_v31 }
 0x550   : > { %5097 = vmatpush1.msra.mxu0 %v5087_v32 }
 0x551   : > { %v5244_v30 = vpop.permute.xlu0 %5243 }
 0x554   : > { %v5246_v34 = vpop.permute.xlu1 %5245  ;;  %7992 = vmatmul.mubr.msk.f32.vlgmr.msra.gmra.mrb[6].mxu0 %vm2019_vm13, %v7991_v33 }
 0x555   : > { %v5248_v35 = vsel %vm827_vm5, %v5244_v30, %v5246_v34  ;;  %v5242_v38 = vpop.permute.xlu0 %5241  ;;  %5319 = vmatprep.mubr.f32.mxu0 %v9041_v0 }
 0x556   : > { %5255 = vmatprep.subr.mxu0 %v5248_v35  ;;  %v5247_v39 = vsel %vm827_vm5, %v5242_v38, %v5244_v30 }
 0x557   : > { %5256 = vmatpush1.msra.mxu0 %v5247_v39 }
 0x558   : > { %v5403_v42 = vpop.permute.xlu1 %5402 }
 0x559   : > { %v5405_v43 = vpop.permute.xlu0 %5404 }
 0x55a   : > { %v5407_v45 = vsel %vm995_vm6, %v5403_v42, %v5405_v43 }
 0x55b   : > { %5414 = vmatprep.subr.mxu0 %v5407_v45 }
 0x55c   : > { %v5401_v47 = vpop.permute.xlu1 %5400  ;;  %7996 = vmatmul.mubr.msk.f32.vlgmr.msra.gmra.mrb[6].mxu0 %vm2019_vm13, %v7995_v44 }
 0x55d   : > { %v5406_v48 = vsel %vm995_vm6, %v5401_v47, %v5403_v42  ;;  %v5560_v51 = vpop.permute.xlu0 %5559  ;;  %5478 = vmatprep.mubr.f32.mxu0 %v9041_v0 }
 0x55e   : > { %5415 = vmatpush1.msra.mxu0 %v5406_v48 }
 0x560   : > { %v5562_v52 = vpop.permute.xlu1 %5561 }
 0x561   : > { %v5564_v46 = vsel %vm1161_vm7, %v5560_v51, %v5562_v52  ;;  %v5558_v54 = vpop.permute.xlu0 %5557 }
 0x562   : > { %5571 = vmatprep.subr.mxu0 %v5564_v46  ;;  %v5563_v55 = vsel %vm1161_vm7, %v5558_v54, %v5560_v51 }
 0x564   : > { %v5715_v56 = vpop.permute.xlu1 %5714  ;;  %8000 = vmatmul.mubr.msk.f32.vlgmr.msra.gmra.mrb[6].mxu0 %vm2019_vm13, %v7999_v53 }
 0x565   : > { %5572 = vmatpush1.msra.mxu0 %v5563_v55  ;;  %v5717_v57 = vpop.permute.xlu0 %5716  ;;  %5635 = vmatprep.mubr.f32.mxu0 %v9041_v0 }
 0x566   : > { %v5721_v58 = vsel %vm1322_vm8, %v5715_v56, %v5717_v57 }
 0x567   : > { %5729 = vmatprep.subr.mxu0 %v5721_v58 }
 0x568   : > { %v5713_v59 = vpop.permute.xlu1 %5712 }
 0x569   : > { %v4924_v60 = vpop.permute.xlu0 %4923  ;;  %v5720_v63 = vsel %vm1322_vm8, %v5713_v59, %v5715_v56 }
 0x56a   : > { %v4927_v61 = vsel %vm484_vm1, %v4922_v22, %v4924_v60 }
 0x56b   : > { %8268 = vmatpush3.msra.mxu1 %v4927_v61 }
 0x56c   : > { %v5086_v1 = vpop.permute.xlu1 %5085  ;;  %8270 = vmatmul.mubr.msk.f32.vlgmr.msra.gmra.mrb[54].mxu1 %vm2019_vm13, %v7987_v26  ;;  %8272 = vmatprep.subr.mxu1 %v9041_v0 }
 0x56d   : > { %v5089_v2 = vsel %vm658_vm3, %v5084_v29, %v5086_v1  ;;  %8003 = vmatmul.mubr.msk.f32.vlgmr.msra.gmra.mrb[6].mxu0 %vm2019_vm13, %v8002_v62  ;;  %v5873_v3 = vpop.permute.xlu0 %5872  ;;  %8274 = vmatprep.mubr.msk.f32.mxu1 %vm8478_vm0, %v9041_v0 }
 0x56e   : > { %5730 = vmatpush1.msra.mxu0 %v5720_v63  ;;  %8273 = vmatpush3.msra.mxu1 %v5089_v2 }
 0x56f   : > { %8277 = vmatprep.subr.mxu1 %v9041_v0  ;;  %5793 = vmatprep.mubr.f32.mxu0 %v9041_v0 }
 0x570   : > { %v5875_v4 = vpop.permute.xlu1 %5874  ;;  %8275 = vmatmul.mubr.msk.f32.vlgmr.msra.gmra.mrb[56].mxu1 %vm2019_vm13, %v7991_v33 }
 0x571   : > { %8278 = vmatpush3.msra.mxu1 %v5246_v34  ;;  %v5879_v5 = vsel %vm1484_vm9, %v5873_v3, %v5875_v4  ;;  %v5871_v6 = vpop.permute.xlu0 %5870  ;;  %8279 = vmatprep.mubr.msk.f32.mxu1 %vm8478_vm0, %v9041_v0 }
 0x572   : > { %5887 = vmatprep.subr.mxu0 %v5879_v5  ;;  %8282 = vmatprep.subr.mxu1 %v9041_v0  ;;  %v5878_v8 = vsel %vm1484_vm9, %v5871_v6, %v5873_v3  ;;  %v8013_v5 = vld [vmem:[%s9509_s11 + $0x8] sm:$0xff] }
 0x574   : > { %v5719_v10 = vpop.permute.xlu1 %5718  ;;  %8280 = vmatmul.mubr.msk.f32.vlgmr.msra.gmra.mrb[58].mxu1 %vm2019_vm13, %v7995_v44 }
 0x575   : > { %8283 = vmatpush3.msra.mxu1 %v5405_v43  ;;  %8005 = vmatmul.mubr.msk.f32.vlgmr.msra.gmra.mrb[6].mxu0 %vm2019_vm13, %v4910_v7  ;;  %v5722_v14 = vsel %vm1322_vm8, %v5717_v57, %v5719_v10  ;;  %v6175_v15 = vpop.permute.xlu0 %6174 }
 0x576   : > { %5888 = vmatpush1.msra.mxu0 %v5878_v8  ;;  %8284 = vmatprep.mubr.msk.f32.mxu1 %vm8478_vm0, %v9041_v0 }
 0x577   : > { %6031 = vmatprep.subr.mxu0 %v9144_v17  ;;  %8287 = vmatprep.subr.mxu1 %v9041_v0 }
 0x578   : > { %v6177_v12 = vpop.permute.xlu1 %6176  ;;  %8285 = vmatmul.mubr.msk.f32.vlgmr.msra.gmra.mrb[60].mxu1 %vm2019_vm13, %v7999_v53  ;;  %5951 = vmatprep.mubr.f32.mxu0 %v9041_v0 }
 0x579   : > { %8288 = vmatpush3.msra.mxu1 %v5562_v52  ;;  %8289 = vmatprep.mubr.msk.f32.mxu1 %vm8478_vm0, %v9041_v0  ;;  %v6179_v18 = vsel %vm1794_vm10, %v6175_v15, %v6177_v12  ;;  %v6173_v19 = vpop.permute.xlu0 %6172 }
 0x57a   : > { %8292 = vmatprep.subr.mxu1 %v9041_v0  ;;  %v6178_v20 = vsel %vm1794_vm10, %v6173_v19, %v6175_v15  ;;  %v8017_v15 = vld [vmem:[%s9509_s11 + $0x18] sm:$0xff] }
 0x57c   : > { %v5877_v37 = vpop.permute.xlu1 %5876  ;;  %8290 = vmatmul.mubr.msk.f32.vlgmr.msra.gmra.mrb[62].mxu1 %vm2019_vm13, %v8002_v62 }
 0x57d   : > { %8293 = vmatpush3.msra.mxu1 %v5722_v14  ;;  %8007 = vmatmul.mubr.msk.f32.vlgmr.msra.gmra.mrb[6].mxu0 %vm2019_vm13, %v7990_v13  ;;  %v5880_v17 = vsel %vm1484_vm9, %v5875_v4, %v5877_v37 }
 0x57e   : > { %6032 = vmatpush1.msra.mxu0 %v9140_v16  ;;  %8294 = vmatprep.mubr.msk.f32.mxu1 %vm8478_vm0, %v9041_v0  ;;  %v7994_v16 = vld [vmem:[%s9507_s9 + $0x20] sm:$0xff] }
 0x57f   : > { %6186 = vmatprep.subr.mxu0 %v6179_v18  ;;  %8297 = vmatprep.subr.mxu1 %v9041_v0 }
 0x580   : > { %8295 = vmatmul.mubr.msk.f32.vlgmr.msra.gmra.mrb[64].mxu1 %vm2019_vm13, %v4910_v7  ;;  %6095 = vmatprep.mubr.f32.mxu0 %v9041_v0 }
 0x581   : > { %8298 = vmatpush3.msra.mxu1 %v5880_v17  ;;  %8299 = vmatprep.mubr.msk.f32.mxu1 %vm8478_vm0, %v9041_v0 }
 0x582   : > { %8302 = vmatprep.subr.mxu1 %v9041_v0 }
 0x584   : > { %8300 = vmatmul.mubr.msk.f32.vlgmr.msra.gmra.mrb[66].mxu1 %vm2019_vm13, %v7990_v13 }
 0x585   : > { %8009 = vmatmul.mubr.msk.f32.vlgmr.msra.gmra.mrb[6].mxu0 %vm2019_vm13, %v7994_v16  ;;  %8303 = vmatpush3.msra.mxu1 %v9165_v50 }
 0x586   : > { %6187 = vmatpush1.msra.mxu0 %v6178_v20  ;;  %8304 = vmatprep.mubr.msk.f32.mxu1 %vm8478_vm0, %v9041_v0 }
 0x587   : > { %8307 = vmatprep.subr.mxu1 %v9041_v0  ;;  %6250 = vmatprep.mubr.f32.mxu0 %v9041_v0 }
 0x588   : > { %8305 = vmatmul.mubr.msk.f32.vlgmr.msra.gmra.mrb[68].mxu1 %vm2019_vm13, %v7994_v16 }
 0x589   : > { %8308 = vmatpush3.msra.mxu1 %v6177_v12  ;;  %8309 = vmatprep.mubr.msk.f32.mxu1 %vm8478_vm0, %v9041_v0 }
 0x58a   : > { %8312 = vmatprep.subr.mxu1 %v9041_v0  ;;  %v6343_v45 = vpop.permute.xlu0 %6342 }
 0x58c   : > { %8310 = vmatmul.mubr.msk.f32.vlgmr.msra.gmra.mrb[70].mxu1 %vm2019_vm13, %v7998_v21 }
 0x58d   : > { %8011 = vmatmul.mubr.msk.f32.vlgmr.msra.gmra.mrb[6].mxu0 %vm2019_vm13, %v7998_v21  ;;  %8314 = vmatprep.mubr.msk.f32.mxu1 %vm8478_vm0, %v9041_v0 }
 0x58e   : > { %6449 = vmatprep.mubr.f32.mxu0 %v9041_v0 }
 0x63f   : > { %v5071_v50 = vpop.f32.mrb[54].mxu1 }
 0x640   : > { %v8271_v22 = vpop.f32.mrb[55].mxu1 }
 0x643   : > { %v5233_v23 = vpop.f32.mrb[56].mxu1 }
 0x644   : > { %v8276_v25 = vpop.f32.mrb[57].mxu1 }
 0x647   : > { %v5392_v26 = vpop.f32.mrb[58].mxu1 }
 0x648   : > { %v8281_v27 = vpop.f32.mrb[59].mxu1 }
 0x64b   : > { %v5551_v28 = vpop.f32.mrb[60].mxu1 }
 0x64c   : > { %v8286_v29 = vpop.f32.mrb[61].mxu1 }
 0x64f   : > { %v5708_v24 = vpop.f32.mrb[62].mxu1 }
 0x650   : > { %v8291_v31 = vpop.f32.mrb[63].mxu1 }
 0x653   : > { %v5866_v32 = vpop.f32.mrb[64].mxu1 }
 0x654   : > { %v5867_v30 = vadd.f32 %v5866_v32, %v5071_v50  ;;  %v8296_v33 = vpop.f32.mrb[65].mxu1  ;;  %v8021_v50 = vld [vmem:[%s9509_s11 + $0x28] sm:$0xff] }
 0x657   : > { %v6024_v34 = vpop.f32.mrb[66].mxu1 }
 0x658   : > { %v6025_v35 = vadd.f32 %v6024_v34, %v5233_v23  ;;  %v8301_v38 = vpop.f32.mrb[67].mxu1 }
 0x65a   : > { %v6329_v39 = vadd.f32 %v6025_v35, %v5867_v30 }
 0x65b   : > { %v6168_v42 = vpop.f32.mrb[68].mxu1 }
 0x65c   : > { %v6169_v43 = vadd.f32 %v6168_v42, %v5392_v26  ;;  %v8306_v44 = vpop.f32.mrb[69].mxu1 }
 0x65f   : > { %v6323_v47 = vpop.f32.mrb[70].mxu1 }
 0x660   : > { %v6252_v48 = vpop.f32.mrb[6].mxu0  ;;  %v6324_v51 = vadd.f32 %v6323_v47, %v5551_v28  ;;  %v8311_v52 = vpop.f32.mrb[71].mxu1 }
 0x661   : > { %v6345_v46 = vadd.f32 %v6343_v45, %v6252_v48  ;;  %v6254_v54 = vpop.f32.mrb[7].mxu0  ;;  %v6361_v48 = vld [vmem:[%s9509_s11] sm:$0xff] }
 0x662   : > { %v6332_v53 = vadd.f32 %v6324_v51, %v6169_v43  ;;  %v6346_v55 = vadd.f32 %v6343_v45, %v6254_v54 }
 0x663   : > { %v6348_v56 = vmax.f32 %v6345_v46, 0.0 }
 0x664   : > { %v6335_v57 = vadd.f32 %v6332_v53, %v6329_v39  ;;  %v6349_v58 = vmax.f32 %v6346_v55, 0.0  ;;  %v8028_v39 = vld [vmem:[%s9509_s11 + $0x40] sm:$0xff]  ;;  %v8016_v55 = vld [vmem:[%s9509_s11 + $0x10] sm:$0xff] }
 0x665   : > { %v9317_v59 = vmul.f32 %v6348_v56, %v8760_v36 }
 0x666   : > { %v6338_v60 = vadd.f32 %v6335_v57, %v5708_v24  ;;  %v9320_v61 = vmul.f32 %v6349_v58, %v8766_v41  ;;  %v7790_v41 = vld [vmem:[%s9510_s12] sm:$0xff]  ;;  %v8025_v24 = vld [vmem:[%s9509_s11 + $0x38] sm:$0xff] }
 0x667   : > { %6370 = vrot.lane.b32.xlu1 %v9317_v59, %s8473_s14  ;;  %v8020_v57 = vld [vmem:[%s9509_s11 + $0x20] sm:$0xff] }
 0x668   : > { %v6347_v62 = vadd.f32 %v6343_v45, %v6338_v60  ;;  %6372 = vrot.lane.b32.xlu0 %v9320_v61, %s8473_s14 }
 0x66a   : > { %v6350_v63 = vmax.f32 %v6347_v62, 0.0 }
 0x66b   : > { %6368 = vrot.lane.b32.xlu1 %v9041_v0, %s8473_s14 }
 0x66c   : > { %v6353_v1 = vmul.f32 %v6350_v63, %v8778_v49  ;;  %6532 = vrot.lane.b32.xlu0 %v9317_v59, %s8474_s15 }
 0x66e   : > { %6356 = vst.msk [vmem:[#allocation2 + $0x18] sm:$0xff] %vm1992_vm12, %v6353_v1 }
 0x66f   : > { %6534 = vrot.lane.b32.xlu1 %v9320_v61, %s8474_s15 }
 0x670   : > { %6530 = vrot.lane.b32.xlu0 %v9041_v0, %s8474_s15 }
 0x673   : > { %6694 = vrot.lane.b32.xlu1 %v9320_v61, %s8475_s16 }
 0x675   : > { %v9338_v36 = vld [vmem:[#allocation2 + $0x18] sm:$0xff] }
 0x676   : > { %6696 = vrot.lane.b32.xlu0 %v9338_v36, %s8475_s16 }
 0x677   : > { %6692 = vrot.lane.b32.xlu1 %v9317_v59, %s8475_s16 }
 0x67a   : > { %6374 = vrot.lane.b32.xlu0 %v9338_v36, %s8473_s14 }
 0x67b   : > { %6855 = vrot.lane.b32.xlu1 %v9338_v36, %s8476_s17 }
 0x67e   : > { %6853 = vrot.lane.b32.xlu0 %v9320_v61, %s8476_s17 }
 0x67f   : > { %6851 = vrot.lane.b32.xlu1 %v9317_v59, %s8476_s17 }
 0x682   : > { %6536 = vrot.lane.b32.xlu0 %v9338_v36, %s8474_s15 }
 0x683   : > { %7010 = vrot.lane.b32.xlu1 %v9320_v61, %s8477_s18 }
 0x686   : > { %7012 = vrot.lane.b32.xlu0 %v9338_v36, %s8477_s18 }
 0x687   : > { %7008 = vrot.lane.b32.xlu1 %v9317_v59, %s8477_s18 }
 0x68a   : > { %7165 = vrot.lane.b32.xlu0 %v9317_v59, %s8479_s19 }
 0x68b   : > { %7167 = vrot.lane.b32.xlu1 %v9320_v61, %s8479_s19 }
 0x68e   : > { %7163 = vrot.lane.b32.xlu0 %v9041_v0, %s8479_s19 }
 0x68f   : > { %7169 = vrot.lane.b32.xlu1 %v9338_v36, %s8479_s19 }
 0x692   : > { %7323 = vrot.lane.b32.xlu0 %v9317_v59, %s8480_s20 }
 0x693   : > { %7325 = vrot.lane.b32.xlu1 %v9320_v61, %s8480_s20 }
 0x696   : > { %7321 = vrot.lane.b32.xlu0 %v9041_v0, %s8480_s20 }
 0x697   : > { %7327 = vrot.lane.b32.xlu1 %v9338_v36, %s8480_s20 }
 0x69a   : > { %7627 = vrot.lane.b32.xlu0 %v9338_v36, %s8481_s21 }
 0x69b   : > { %7625 = vrot.lane.b32.xlu1 %v9320_v61, %s8481_s21 }
 0x69e   : > { %7623 = vrot.lane.b32.xlu0 %v9317_v59, %s8481_s21 }
 0x69f   : > { %7793 = vperm.xlu1 %8458, %v7790_v41  }
 0x6d9   : > { %v6371_v49 = vpop.permute.xlu1 %6370 }
 0x6da   : > { %v6373_v2 = vpop.permute.xlu0 %6372 }
 0x6db   : > { %v6377_v3 = vsel %vm484_vm1, %v6371_v49, %v6373_v2 }
 0x6dc   : > { %6385 = vmatprep.subr.mxu0 %v6377_v3 }
 0x6dd   : > { %v6369_v4 = vpop.permute.xlu1 %6368 }
 0x6de   : > { %v6376_v6 = vsel %vm484_vm1, %v6369_v4, %v6371_v49  ;;  %v6533_v7 = vpop.permute.xlu0 %6532 }
 0x6df   : > { %6386 = vmatpush1.msra.mxu0 %v6376_v6 }
 0x6e0   : > { %8014 = vmatmul.mubr.msk.f32.vlgmr.msra.gmra.mrb[8].mxu0 %vm2019_vm13, %v8013_v5 }
 0x6e1   : > { %v6535_v8 = vpop.permute.xlu1 %6534  ;;  %6611 = vmatprep.mubr.f32.mxu0 %v9041_v0 }
 0x6e2   : > { %v6531_v10 = vpop.permute.xlu0 %6530  ;;  %v6539_v12 = vsel %vm658_vm3, %v6533_v7, %v6535_v8 }
 0x6e3   : > { %v6538_v13 = vsel %vm658_vm3, %v6531_v10, %v6533_v7  ;;  %6547 = vmatprep.subr.mxu0 %v6539_v12 }
 0x6e4   : > { %6548 = vmatpush1.msra.mxu0 %v6538_v13 }
 0x6e5   : > { %v6695_v14 = vpop.permute.xlu1 %6694 }
 0x6e8   : > { %v6697_v37 = vpop.permute.xlu0 %6696  ;;  %8018 = vmatmul.mubr.msk.f32.vlgmr.msra.gmra.mrb[8].mxu0 %vm2019_vm13, %v8017_v15 }
 0x6e9   : > { %v6699_v17 = vsel %vm827_vm5, %v6695_v14, %v6697_v37  ;;  %v6693_v18 = vpop.permute.xlu1 %6692  ;;  %6770 = vmatprep.mubr.f32.mxu0 %v9041_v0 }
 0x6ea   : > { %6706 = vmatprep.subr.mxu0 %v6699_v17  ;;  %v6698_v19 = vsel %vm827_vm5, %v6693_v18, %v6695_v14 }
 0x6eb   : > { %6707 = vmatpush1.msra.mxu0 %v6698_v19 }
 0x6ec   : > { %v6375_v16 = vpop.permute.xlu0 %6374 }
 0x6ed   : > { %v6378_v20 = vsel %vm484_vm1, %v6373_v2, %v6375_v16  ;;  %v6856_v21 = vpop.permute.xlu1 %6855 }
 0x6ee   : > { %8313 = vmatpush3.msra.mxu1 %v6378_v20 }
 0x6ef   : > { %8315 = vmatmul.mubr.msk.f32.vlgmr.msra.gmra.mrb[72].mxu1 %vm2019_vm13, %v8013_v5  ;;  %8317 = vmatprep.subr.mxu1 %v9041_v0 }
 0x6f0   : > { %v6854_v22 = vpop.permute.xlu0 %6853  ;;  %8022 = vmatmul.mubr.msk.f32.vlgmr.msra.gmra.mrb[8].mxu0 %vm2019_vm13, %v8021_v50  ;;  %8319 = vmatprep.mubr.msk.f32.mxu1 %vm8478_vm0, %v9041_v0 }
 0x6f1   : > { %v6858_v23 = vsel %vm995_vm6, %v6854_v22, %v6856_v21  ;;  %v6852_v25 = vpop.permute.xlu1 %6851  ;;  %6929 = vmatprep.mubr.f32.mxu0 %v9041_v0 }
 0x6f2   : > { %6865 = vmatprep.subr.mxu0 %v6858_v23  ;;  %v6857_v26 = vsel %vm995_vm6, %v6852_v25, %v6854_v22 }
 0x6f3   : > { %6866 = vmatpush1.msra.mxu0 %v6857_v26 }
 0x6f4   : > { %v6537_v27 = vpop.permute.xlu0 %6536 }
 0x6f5   : > { %v6540_v28 = vsel %vm658_vm3, %v6535_v8, %v6537_v27  ;;  %v7011_v29 = vpop.permute.xlu1 %7010 }
 0x6f6   : > { %8318 = vmatpush3.msra.mxu1 %v6540_v28 }
 0x6f7   : > { %8320 = vmatmul.mubr.msk.f32.vlgmr.msra.gmra.mrb[74].mxu1 %vm2019_vm13, %v8017_v15  ;;  %8322 = vmatprep.subr.mxu1 %v9041_v0 }
 0x6f8   : > { %v7013_v31 = vpop.permute.xlu0 %7012  ;;  %8323 = vmatpush3.msra.mxu1 %v6697_v37  ;;  %8324 = vmatprep.mubr.msk.f32.mxu1 %vm8478_vm0, %v9041_v0 }
 0x6f9   : > { %8026 = vmatmul.mubr.msk.f32.vlgmr.msra.gmra.mrb[8].mxu0 %vm2019_vm13, %v8025_v24  ;;  %8327 = vmatprep.subr.mxu1 %v9041_v0  ;;  %v7015_v32 = vsel %vm1161_vm7, %v7011_v29, %v7013_v31  ;;  %v7009_v30 = vpop.permute.xlu1 %7008 }
 0x6fa   : > { %7022 = vmatprep.subr.mxu0 %v7015_v32  ;;  %v7014_v33 = vsel %vm1161_vm7, %v7009_v30, %v7011_v29  ;;  %7086 = vmatprep.mubr.f32.mxu0 %v9041_v0  ;;  %v8463_v29 = vld [vmem:[#allocation2] sm:$0xff] }
 0x6fb   : > { %8325 = vmatmul.mubr.msk.f32.vlgmr.msra.gmra.mrb[76].mxu1 %vm2019_vm13, %v8021_v50  ;;  %7023 = vmatpush1.msra.mxu0 %v7014_v33 }
 0x6fc   : > { %8328 = vmatpush3.msra.mxu1 %v6856_v21  ;;  %v7166_v34 = vpop.permute.xlu0 %7165  ;;  %8329 = vmatprep.mubr.msk.f32.mxu1 %vm8478_vm0, %v9041_v0 }
 0x6fd   : > { %8332 = vmatprep.subr.mxu1 %v9041_v0  ;;  %v7168_v35 = vpop.permute.xlu1 %7167 }
 0x6fe   : > { %v7172_v38 = vsel %vm1322_vm8, %v7166_v34, %v7168_v35 }
 0x6ff   : > { %8330 = vmatmul.mubr.msk.f32.vlgmr.msra.gmra.mrb[78].mxu1 %vm2019_vm13, %v8025_v24  ;;  %7180 = vmatprep.subr.mxu0 %v7172_v38 }
 0x700   : > { %8333 = vmatpush3.msra.mxu1 %v7013_v31  ;;  %v7164_v42 = vpop.permute.xlu0 %7163  ;;  %8334 = vmatprep.mubr.msk.f32.mxu1 %vm8478_vm0, %v9041_v0 }
 0x701   : > { %v7171_v43 = vsel %vm1322_vm8, %v7164_v42, %v7166_v34  ;;  %8029 = vmatmul.mubr.msk.f32.vlgmr.msra.gmra.mrb[8].mxu0 %vm2019_vm13, %v8028_v39  ;;  %v7170_v44 = vpop.permute.xlu1 %7169  ;;  %8337 = vmatprep.subr.mxu1 %v9041_v0 }
 0x702   : > { %7181 = vmatpush1.msra.mxu0 %v7171_v43  ;;  %v7173_v45 = vsel %vm1322_vm8, %v7168_v35, %v7170_v44  ;;  %7244 = vmatprep.mubr.f32.mxu0 %v9041_v0 }
 0x703   : > { %8335 = vmatmul.mubr.msk.f32.vlgmr.msra.gmra.mrb[80].mxu1 %vm2019_vm13, %v8028_v39 }
 0x704   : > { %v7324_v47 = vpop.permute.xlu0 %7323  ;;  %8338 = vmatpush3.msra.mxu1 %v7173_v45  ;;  %8339 = vmatprep.mubr.msk.f32.mxu1 %vm8478_vm0, %v9041_v0 }
 0x705   : > { %v7326_v51 = vpop.permute.xlu1 %7325  ;;  %8342 = vmatprep.subr.mxu1 %v9041_v0 }
 0x706   : > { %v7330_v52 = vsel %vm1484_vm9, %v7324_v47, %v7326_v51 }
 0x707   : > { %8340 = vmatmul.mubr.msk.f32.vlgmr.msra.gmra.mrb[82].mxu1 %vm2019_vm13, %v6361_v48  ;;  %7338 = vmatprep.subr.mxu0 %v7330_v52 }
 0x708   : > { %v7322_v46 = vpop.permute.xlu0 %7321  ;;  %8344 = vmatprep.mubr.msk.f32.mxu1 %vm8478_vm0, %v9041_v0 }
 0x709   : > { %v7329_v54 = vsel %vm1484_vm9, %v7322_v46, %v7324_v47  ;;  %8031 = vmatmul.mubr.msk.f32.vlgmr.msra.gmra.mrb[8].mxu0 %vm2019_vm13, %v6361_v48  ;;  %v7328_v53 = vpop.permute.xlu1 %7327 }
 0x70a   : > { %7339 = vmatpush1.msra.mxu0 %v7329_v54  ;;  %v7331_v56 = vsel %vm1484_vm9, %v7326_v51, %v7328_v53  ;;  %7402 = vmatprep.mubr.f32.mxu0 %v9041_v0 }
 0x70b   : > { %7482 = vmatprep.subr.mxu0 %v9320_v61  ;;  %8343 = vmatpush3.msra.mxu1 %v7331_v56  ;;  %v8024_v61 = vld [vmem:[%s9509_s11 + $0x30] sm:$0xff] }
 0x70c   : > { %8345 = vmatmul.mubr.msk.f32.vlgmr.msra.gmra.mrb[84].mxu1 %vm2019_vm13, %v8016_v55  ;;  %8347 = vmatprep.subr.mxu1 %v9041_v0  ;;  %v7628_v58 = vpop.permute.xlu0 %7627 }
 0x70d   : > { %8348 = vmatpush3.msra.mxu1 %v9338_v36  ;;  %8349 = vmatprep.mubr.msk.f32.mxu1 %vm8478_vm0, %v9041_v0  ;;  %v7626_v60 = vpop.permute.xlu1 %7625 }
 0x70e   : > { %8352 = vmatprep.subr.mxu1 %v9041_v0  ;;  %v7630_v62 = vsel %vm1794_vm10, %v7626_v60, %v7628_v58 }
 0x710   : > { %8350 = vmatmul.mubr.msk.f32.vlgmr.msra.gmra.mrb[86].mxu1 %vm2019_vm13, %v8020_v57  ;;  %v7624_v63 = vpop.permute.xlu0 %7623 }
 0x711   : > { %8033 = vmatmul.mubr.msk.f32.vlgmr.msra.gmra.mrb[8].mxu0 %vm2019_vm13, %v8016_v55  ;;  %8353 = vmatpush3.msra.mxu1 %v7628_v58  ;;  %v7629_v1 = vsel %vm1794_vm10, %v7624_v63, %v7626_v60 }
 0x712   : > { %7483 = vmatpush1.msra.mxu0 %v9317_v59  ;;  %8354 = vmatprep.mubr.msk.f32.mxu1 %vm8478_vm0, %v9041_v0 }
 0x713   : > { %7637 = vmatprep.subr.mxu0 %v7630_v62  ;;  %7546 = vmatprep.mubr.f32.mxu0 %v9041_v0 }
 0x714   : > { %8355 = vmatmul.mubr.msk.f32.vlgmr.msra.gmra.mrb[88].mxu1 %vm2019_vm13, %v8024_v61 }
 0x719   : > { %8035 = vmatmul.mubr.msk.f32.vlgmr.msra.gmra.mrb[8].mxu0 %vm2019_vm13, %v8020_v57 }
 0x71a   : > { %7638 = vmatpush1.msra.mxu0 %v7629_v1  ;;  %7701 = vmatprep.mubr.f32.mxu0 %v9041_v0 }
 0x71e   : > { %v7794_v23 = vpop.permute.xlu1 %7793 }
 0x721   : > { %8037 = vmatmul.mubr.msk.f32.vlgmr.msra.gmra.mrb[8].mxu0 %vm2019_vm13, %v8024_v61 }
 0x7c2   : > { %v6522_v59 = vpop.f32.mrb[72].mxu1 }
 0x7c3   : > { %v8316_v36 = vpop.f32.mrb[73].mxu1 }
 0x7ca   : > { %v6684_v41 = vpop.f32.mrb[74].mxu1 }
 0x7cb   : > { %v8321_v49 = vpop.f32.mrb[75].mxu1 }
 0x7ce   : > { %v6843_v2 = vpop.f32.mrb[76].mxu1 }
 0x7cf   : > { %v8326_v3 = vpop.f32.mrb[77].mxu1 }
 0x7d2   : > { %v7002_v4 = vpop.f32.mrb[78].mxu1 }
 0x7d3   : > { %v8331_v5 = vpop.f32.mrb[79].mxu1 }
 0x7d6   : > { %v7159_v6 = vpop.f32.mrb[80].mxu1 }
 0x7d7   : > { %v8336_v7 = vpop.f32.mrb[81].mxu1 }
 0x7da   : > { %v7317_v8 = vpop.f32.mrb[82].mxu1 }
 0x7db   : > { %v7318_v10 = vadd.f32 %v7317_v8, %v6522_v59  ;;  %v8341_v12 = vpop.f32.mrb[83].mxu1 }
 0x7df   : > { %v7475_v13 = vpop.f32.mrb[84].mxu1 }
 0x7e0   : > { %v7476_v14 = vadd.f32 %v7475_v13, %v6684_v41  ;;  %v8346_v15 = vpop.f32.mrb[85].mxu1 }
 0x7e2   : > { %v7780_v0 = vadd.f32 %v7476_v14, %v7318_v10 }
 0x7e3   : > { %v7619_v37 = vpop.f32.mrb[86].mxu1 }
 0x7e4   : > { %v7620_v17 = vadd.f32 %v7619_v37, %v6843_v2  ;;  %v8351_v18 = vpop.f32.mrb[87].mxu1 }
 0x7e7   : > { %v7774_v19 = vpop.f32.mrb[88].mxu1 }
 0x7e8   : > { %v7775_v16 = vadd.f32 %v7774_v19, %v7002_v4  ;;  %v8356_v20 = vpop.f32.mrb[89].mxu1 }
 0x7ea   : > { %v7783_v21 = vadd.f32 %v7775_v16, %v7620_v17 }
 0x7ec   : > { %v7786_v50 = vadd.f32 %v7783_v21, %v7780_v0 }
 0x7ee   : > { %v7789_v22 = vadd.f32 %v7786_v50, %v7159_v6 }
 0x7f0   : > { %v7798_v25 = vadd.f32 %v7794_v23, %v7789_v22 }
 0x7f2   : > { %v7801_v26 = vadd.f32 %v7798_v25, %v9148_v40 }
 0x7f4   : > { %v7703_v27 = vpop.f32.mrb[8].mxu0  ;;  %7804 = vst.msk [vmem:[%s460_s29 + $0x10] sm:$0xff] %vm1992_vm12, %v7801_v26 }
 0x7f5   : > { %v7796_v28 = vadd.f32 %v7794_v23, %v7703_v27  ;;  %7805 = vst.msk [vmem:[%s460_s29 + $0x10] sm:$0xff] %vm463_vm11, %v8463_v29  ;;  %v7705_v24 = vpop.f32.mrb[9].mxu0 }
 0x7f6   : > { %v7797_v31 = vadd.f32 %v7794_v23, %v7705_v24 }
 0x7f7   : > { %v7799_v32 = vadd.f32 %v7796_v28, %v9133_v9 }
 0x7f8   : > { %v7800_v30 = vadd.f32 %v7797_v31, %v9135_v11 }
 0x7f9   : > { %7802 = vst [vmem:[%s460_s29] sm:$0xff] %v7799_v32 }
 0x7fa   : > { %7803 = vst [vmem:[%s460_s29 + $0x8] sm:$0xff] %v7800_v30 }
 0x7fb PF: > { %s23_s25 = sadd.s32 1, %s8470_s25  }
 0x7fc   : > { %p20_p4 = scmp.ge.s32.totalorder %s23_s25, 4  }
 0x7fe   :  { %22 = sbr.rel (!%p20_p4) target bundleno = 1 (0x1), region = 145 }

</bundles_post_ra>
